<compile_context>
chip_gen: v7x
topology: tpu7x:2x2x1
jax: 0.10.0
libtpu: 0.0.40
codegen_flags: <defaults>
</compile_context>

<pallas_src>
import jax
import jax.numpy as jnp
from jax import lax
from jax.experimental import pallas as pl
from jax.experimental.pallas import tpu as pltpu


# --------------------------------------------------------------------------
# Helpers
# --------------------------------------------------------------------------
def _lane_rotate(v, shift):
    """Circular rotate along the last axis: out[..., l] = v[..., (l+shift) % n]."""
    n = v.shape[-1]
    shift = shift % n
    if shift == 0:
        return v
    return jnp.concatenate([v[..., shift:], v[..., :shift]], axis=-1)


def _block_diag_weights(w_hwio, W, glu_halves):
    """(3,3,Cin,Cout) HWIO -> (9, W*Cin, W*Cout) bf16 per-tap block-diagonal
    weights for the lane-dense conv.  With glu_halves=True the output lanes are
    permuted so channels [0, Cout/2) fill lanes [0, W*Cout/2) (GLU value half)
    and the rest fill the top half (gate)."""
    kh, kw, cin, cout = w_hwio.shape
    eye_w = jnp.eye(W, dtype=jnp.float32)
    # bd[i,j, w*Cin+ci, w'*Cout+co] = (w == w') * Wt[i,j,ci,co]
    bd = jnp.einsum("ab,ijcd->ijacbd", eye_w, w_hwio.astype(jnp.float32))
    bd = bd.reshape(kh * kw, W * cin, W * cout)
    if glu_halves:
        half = cout // 2
        w_idx = jnp.arange(W)
        h_idx = jnp.arange(2)
        c_idx = jnp.arange(half)
        # new lane (half, w', cc)  <-  old lane w'*Cout + half*C + cc
        old = (w_idx[None, :, None] * cout
               + h_idx[:, None, None] * half
               + c_idx[None, None, :]).reshape(-1)
        bd = jnp.take(bd, old, axis=2)
    return bd.astype(jnp.bfloat16)


def _samples_per_step(batch):
    # v7x: 2 TensorCores/chip -> one sample per grid step + ("parallel",).
    # v5e/v6e: single TC -> fuse the whole batch into one grid step.
    kind = jax.devices()[0].device_kind.lower()
    if batch > 1 and ("v7" in kind or "7x" in kind):
        return 1
    return batch


# --------------------------------------------------------------------------
# Fused kernel (NB samples per grid step, all lane-dense)
# --------------------------------------------------------------------------
def _make_kernel(NB, H, W, C):
    WC = W * C
    inv_hw = 1.0 / float(H * W)

    def kernel(x_ref, w1_ref, w2_ref, o_ref, pad_ref):
        # x_ref  : (NB, H, WC)     f32   lane-dense input  (lane = w*C + c)
        # w1_ref : (9, WC, 2*WC)   bf16  per-tap block-diag conv1 weights
        # w2_ref : (9, WC, WC)     bf16  per-tap block-diag conv2 weights
        # o_ref  : (NB, H, WC)     f32   lane-dense output
        # pad_ref: (NB, H+2, WC)   f32   row-reflected activation scratch
        lane = lax.broadcasted_iota(jnp.int32, (NB * H, WC), 1)
        first_col = lane < C            # lanes of output column w = 0
        last_col = lane >= (WC - C)     # lanes of output column w = W-1

        def fill_pad(v):
            # Row reflection only: pad_ref rows = [x1, x0..x(H-1), x(H-2)].
            pad_ref[:, 1:H + 1, :] = v
            pad_ref[:, 0:1, :] = v[:, 1:2, :]
            pad_ref[:, H + 1:H + 2, :] = v[:, H - 2:H - 1, :]

        def conv3x3(w_ref, cout_lanes):
            # 9 lane-dense tap matmuls accumulated in f32 (bf16 MXU operands).
            acc = jnp.zeros((NB * H, cout_lanes), jnp.float32)
            for i in range(3):
                rows = pad_ref[:, i:i + H, :].reshape(NB * H, WC)
                nxt = _lane_rotate(rows, C)        # column w+1 at lane w*C+c
                prv = _lane_rotate(rows, WC - C)   # column w-1 at lane w*C+c
                windows = (
                    jnp.where(first_col, nxt, prv),  # j=0: col w-1; w=0 -> col 1
                    rows,                            # j=1: col w
                    jnp.where(last_col, prv, nxt),   # j=2: col w+1; w=W-1 -> col W-2
                )
                for j in range(3):
                    acc = acc + jnp.dot(
                        windows[j].astype(jnp.bfloat16), w_ref[3 * i + j],
                        preferred_element_type=jnp.float32)
            return acc

        def channel_sums(v):
            # v: (NB, 1, L) row-reduced sums; returns per-(sample, channel)
            # sums broadcast across the w lane positions, per 128-lane half.
            parts = []
            for h0 in range(0, v.shape[-1], WC):
                s = v[:, :, h0:h0 + WC]
                shift = C
                while shift < WC:                  # log2(W) doubling rotations
                    s = s + _lane_rotate(s, shift)
                    shift *= 2
                parts.append(s)
            return parts[0] if len(parts) == 1 else jnp.concatenate(parts, axis=-1)

        def instance_norm(y):
            # y: (NB*H, L) f32, channel = lane % C within each WC half.
            # InstanceNorm2d(affine=False): biased var, eps inside rsqrt.
            L = y.shape[-1]
            y3 = y.reshape(NB, H, L)
            mean = channel_sums(jnp.sum(y3, axis=1, keepdims=True)) * inv_hw
            cen = y3 - mean
            var = channel_sums(jnp.sum(cen * cen, axis=1, keepdims=True)) * inv_hw
            return (cen * lax.rsqrt(var + 1e-5)).reshape(NB * H, L)

        x = x_ref[...]                                       # (NB, H, WC) f32

        # ---- conv1 (C -> 2C) + InstanceNorm + GLU ----
        fill_pad(x)
        y1 = instance_norm(conv3x3(w1_ref, 2 * WC))          # (NB*H, 2*WC)
        gate = pl.reciprocal(1.0 + jnp.exp(-y1[:, WC:]), approx=True)   # EUP
        h = y1[:, :WC] * gate                                # (NB*H, WC)

        # ---- conv2 (C -> C) + InstanceNorm ----
        fill_pad(h.reshape(NB, H, WC))
        y2 = instance_norm(conv3x3(w2_ref, WC))              # (NB*H, WC)

        # ---- residual add + single unmasked lane-dense store ----
        o_ref[...] = (y2 + x.reshape(NB * H, WC)).reshape(NB, H, WC)

    return kernel


# --------------------------------------------------------------------------
# Wrapper
# --------------------------------------------------------------------------
@jax.jit
def hmap_resblock_forward(x_nchw, w1_hwio, w2_hwio):
    """x: (B, C, H, W); w1: (3,3,C,2C) HWIO; w2: (3,3,C,C) HWIO -> (B, C, H, W)."""
    B, C, H, W = x_nchw.shape
    WC = W * C
    assert W & (W - 1) == 0, "lane-dense InstanceNorm reduce assumes power-of-two W"
    assert H >= 2 and W >= 2, "ReflectionPad2d(1) needs spatial dims >= 2"

    # Lane-dense activations: NCHW -> NHWC -> (B, H, W*C), lane = w*C + c.
    x_lane = jnp.transpose(x_nchw, (0, 2, 3, 1)).reshape(B, H, WC).astype(jnp.float32)
    bd1 = _block_diag_weights(w1_hwio, W, glu_halves=True)    # (9, WC, 2*WC) bf16
    bd2 = _block_diag_weights(w2_hwio, W, glu_halves=False)   # (9, WC, WC)   bf16

    nb = _samples_per_step(B)
    grid = (B // nb,)

    out_lane = pl.pallas_call(
        _make_kernel(nb, H, W, C),
        out_shape=jax.ShapeDtypeStruct((B, H, WC), jnp.float32),
        grid=grid,
        in_specs=[
            pl.BlockSpec((nb, H, WC), lambda b: (b, 0, 0)),
            pl.BlockSpec((9, WC, 2 * WC), lambda b: (0, 0, 0)),
            pl.BlockSpec((9, WC, WC), lambda b: (0, 0, 0)),
        ],
        out_specs=pl.BlockSpec((nb, H, WC), lambda b: (b, 0, 0)),
        scratch_shapes=[pltpu.VMEM((nb, H + 2, WC), jnp.float32)],
        compiler_params=pltpu.CompilerParams(
            dimension_semantics=("parallel",) if grid[0] > 1 else ("arbitrary",),
            vmem_limit_bytes=8 * 1024 * 1024,   # ~2 MiB real footprint + headroom
        ),
    )(x_lane, bd1, bd2)

    return jnp.transpose(out_lane.reshape(B, H, W, C), (0, 3, 1, 2))  # back to NCHW


# --------------------------------------------------------------------------
# Pure-JAX reference (same bf16-operand / f32-accumulate conv policy).
# --------------------------------------------------------------------------
def hmap_resblock_reference(x, w1, w2):
    C = x.shape[1]

    def conv3x3_reflect(h, w):
        hp = jnp.pad(h, ((0, 0), (0, 0), (1, 1), (1, 1)), mode="reflect")
        return lax.conv_general_dilated(
            hp.astype(jnp.bfloat16), w.astype(jnp.bfloat16),
            window_strides=(1, 1), padding="VALID",
            dimension_numbers=("NCHW", "HWIO", "NCHW"),
            preferred_element_type=jnp.float32)

    def inorm(h):
        m = jnp.mean(h, axis=(2, 3), keepdims=True)
        v = jnp.var(h, axis=(2, 3), keepdims=True)
        return (h - m) * lax.rsqrt(v + 1e-5)

    y = inorm(conv3x3_reflect(x, w1))
    y = y[:, :C] * jax.nn.sigmoid(y[:, C:])                  # GLU
    y = inorm(conv3x3_reflect(y, w2))
    return y + x                                             # residual


if __name__ == "__main__":
    # batch=2, channel_num=8, 16x16 heatmap -> W*C = 128 (lane-dense).
    B, C, H = 2, 8, 16

    key = jax.random.PRNGKey(0)
    kx, k1, k2 = jax.random.split(key, 3)
    x = jax.random.normal(kx, (B, C, H, H), dtype=jnp.float32)
    w1 = 0.1 * jax.random.normal(k1, (3, 3, C, 2 * C), dtype=jnp.float32)
    w2 = 0.1 * jax.random.normal(k2, (3, 3, C, C), dtype=jnp.float32)

    out = jax.block_until_ready(hmap_resblock_forward(x, w1, w2))
    assert out.shape == x.shape, out.shape

    ref = hmap_resblock_reference(x, w1, w2)
    max_err = float(jnp.max(jnp.abs(out - ref)))
    assert jnp.allclose(out, ref, atol=1e-2, rtol=1e-2), max_err

    print("KERNEL_OK")
</pallas_src>

<mosaic_0001>
module attributes {stable_mosaic.version = 11 : i64} {
  func.func @kernel(%arg0: i32, %arg1: memref<2x16x128xf32, #tpu.memory_space<vmem>>, %arg2: memref<9x128x256xbf16, #tpu.memory_space<vmem>>, %arg3: memref<9x128x128xbf16, #tpu.memory_space<vmem>>, %arg4: memref<2x16x128xf32, #tpu.memory_space<vmem>>, %arg5: memref<2x18x128xf32, #tpu.memory_space<vmem>>) attributes {dimension_semantics = [#tpu.dimension_semantics<arbitrary>], iteration_bounds = array<i64: 1>, scalar_prefetch = 0 : i64, scratch_operands = 1 : i64, tpu.core_type = #tpu.core_type<tc>, window_params = [{transform_indices = @transform_0, window_bounds = array<i64: 2, 16, 128>}, {pipeline_mode = #tpu.pipeline_mode<synchronous>, transform_indices = @transform_1, window_bounds = array<i64: 9, 128, 256>}, {pipeline_mode = #tpu.pipeline_mode<synchronous>, transform_indices = @transform_2, window_bounds = array<i64: 9, 128, 128>}, {transform_indices = @transform_3, window_bounds = array<i64: 2, 16, 128>}]} {
    %0 = tpu.iota {dimensions = array<i32: 1>} : vector<32x128xi32>
    %c8_i32 = arith.constant 8 : i32
    %1 = vector.broadcast %c8_i32 : i32 to vector<32x128xi32>
    %2 = arith.cmpi slt, %0, %1 : vector<32x128xi32>
    %c120_i32 = arith.constant 120 : i32
    %3 = vector.broadcast %c120_i32 : i32 to vector<32x128xi32>
    %4 = arith.cmpi sge, %0, %3 : vector<32x128xi32>
    %c0 = arith.constant 0 : index
    %c0_0 = arith.constant 0 : index
    %c0_1 = arith.constant 0 : index
    %5 = vector.load %arg1[%c0, %c0_0, %c0_1] : memref<2x16x128xf32, #tpu.memory_space<vmem>>, vector<2x16x128xf32>
    %c0_2 = arith.constant 0 : index
    %c1 = arith.constant 1 : index
    %c0_3 = arith.constant 0 : index
    %6 = vector.load %arg5[%c0_2, %c1, %c0_3] : memref<2x18x128xf32, #tpu.memory_space<vmem>>, vector<2x16x128xf32>
    tpu.vector_store %arg5[%c0_2, %c1, %c0_3], %5 {strides = array<i32>} : memref<2x18x128xf32, #tpu.memory_space<vmem>>, vector<2x16x128xf32>,
    %7 = vector.extract_strided_slice %5 {offsets = [0, 1, 0], sizes = [2, 1, 128], strides = [1, 1, 1]} : vector<2x16x128xf32> to vector<2x1x128xf32>
    %c0_4 = arith.constant 0 : index
    %c0_5 = arith.constant 0 : index
    %c0_6 = arith.constant 0 : index
    %8 = vector.load %arg5[%c0_4, %c0_5, %c0_6] : memref<2x18x128xf32, #tpu.memory_space<vmem>>, vector<2x1x128xf32>
    tpu.vector_store %arg5[%c0_4, %c0_5, %c0_6], %7 {strides = array<i32>} : memref<2x18x128xf32, #tpu.memory_space<vmem>>, vector<2x1x128xf32>,
    %9 = vector.extract_strided_slice %5 {offsets = [0, 14, 0], sizes = [2, 1, 128], strides = [1, 1, 1]} : vector<2x16x128xf32> to vector<2x1x128xf32>
    %c0_7 = arith.constant 0 : index
    %c17 = arith.constant 17 : index
    %c0_8 = arith.constant 0 : index
    %10 = vector.load %arg5[%c0_7, %c17, %c0_8] : memref<2x18x128xf32, #tpu.memory_space<vmem>>, vector<2x1x128xf32>
    tpu.vector_store %arg5[%c0_7, %c17, %c0_8], %9 {strides = array<i32>} : memref<2x18x128xf32, #tpu.memory_space<vmem>>, vector<2x1x128xf32>,
    %cst = arith.constant 0.000000e+00 : f32
    %11 = vector.broadcast %cst : f32 to vector<32x256xf32>
    %c0_9 = arith.constant 0 : index
    %c0_10 = arith.constant 0 : index
    %c0_11 = arith.constant 0 : index
    %12 = vector.load %arg5[%c0_9, %c0_10, %c0_11] : memref<2x18x128xf32, #tpu.memory_space<vmem>>, vector<2x16x128xf32>
    %13 = vector.shape_cast %12 : vector<2x16x128xf32> to vector<32x128xf32>
    %14 = vector.extract_strided_slice %13 {offsets = [0, 8], sizes = [32, 120], strides = [1, 1]} : vector<32x128xf32> to vector<32x120xf32>
    %15 = vector.extract_strided_slice %13 {offsets = [0, 0], sizes = [32, 8], strides = [1, 1]} : vector<32x128xf32> to vector<32x8xf32>
    %16 = tpu.concatenate %14, %15 in 1 : vector<32x120xf32>, vector<32x8xf32> -> vector<32x128xf32>
    %17 = vector.extract_strided_slice %13 {offsets = [0, 120], sizes = [32, 8], strides = [1, 1]} : vector<32x128xf32> to vector<32x8xf32>
    %18 = vector.extract_strided_slice %13 {offsets = [0, 0], sizes = [32, 120], strides = [1, 1]} : vector<32x128xf32> to vector<32x120xf32>
    %19 = tpu.concatenate %17, %18 in 1 : vector<32x8xf32>, vector<32x120xf32> -> vector<32x128xf32>
    %20 = arith.select %2, %16, %19 : vector<32x128xi1>, vector<32x128xf32>
    %21 = arith.select %4, %19, %16 : vector<32x128xi1>, vector<32x128xf32>
    %22 = arith.truncf %20 : vector<32x128xf32> to vector<32x128xbf16>
    %c0_12 = arith.constant 0 : index
    %c0_13 = arith.constant 0 : index
    %c0_14 = arith.constant 0 : index
    %23 = vector.load %arg2[%c0_12, %c0_13, %c0_14] : memref<9x128x256xbf16, #tpu.memory_space<vmem>>, vector<1x128x256xbf16>
    %24 = vector.shape_cast %23 : vector<1x128x256xbf16> to vector<128x256xbf16>
    %cst_15 = arith.constant dense<0.000000e+00> : vector<32x256xf32>
    %25 = tpu.matmul %22, %24, %cst_15 {dimension_numbers = #tpu.dot_dimension_numbers<[1], [0], [0], [1], [0, 0, 1, 1], [], []>} : vector<32x128xbf16>, vector<128x256xbf16>, vector<32x256xf32> -> vector<32x256xf32>
    %26 = arith.addf %11, %25 : vector<32x256xf32>
    %27 = arith.truncf %13 : vector<32x128xf32> to vector<32x128xbf16>
    %c1_16 = arith.constant 1 : index
    %c0_17 = arith.constant 0 : index
    %c0_18 = arith.constant 0 : index
    %28 = vector.load %arg2[%c1_16, %c0_17, %c0_18] : memref<9x128x256xbf16, #tpu.memory_space<vmem>>, vector<1x128x256xbf16>
    %29 = vector.shape_cast %28 : vector<1x128x256xbf16> to vector<128x256xbf16>
    %cst_19 = arith.constant dense<0.000000e+00> : vector<32x256xf32>
    %30 = tpu.matmul %27, %29, %cst_19 {dimension_numbers = #tpu.dot_dimension_numbers<[1], [0], [0], [1], [0, 0, 1, 1], [], []>} : vector<32x128xbf16>, vector<128x256xbf16>, vector<32x256xf32> -> vector<32x256xf32>
    %31 = arith.addf %26, %30 : vector<32x256xf32>
    %32 = arith.truncf %21 : vector<32x128xf32> to vector<32x128xbf16>
    %c2 = arith.constant 2 : index
    %c0_20 = arith.constant 0 : index
    %c0_21 = arith.constant 0 : index
    %33 = vector.load %arg2[%c2, %c0_20, %c0_21] : memref<9x128x256xbf16, #tpu.memory_space<vmem>>, vector<1x128x256xbf16>
    %34 = vector.shape_cast %33 : vector<1x128x256xbf16> to vector<128x256xbf16>
    %cst_22 = arith.constant dense<0.000000e+00> : vector<32x256xf32>
    %35 = tpu.matmul %32, %34, %cst_22 {dimension_numbers = #tpu.dot_dimension_numbers<[1], [0], [0], [1], [0, 0, 1, 1], [], []>} : vector<32x128xbf16>, vector<128x256xbf16>, vector<32x256xf32> -> vector<32x256xf32>
    %36 = arith.addf %31, %35 : vector<32x256xf32>
    %c0_23 = arith.constant 0 : index
    %c1_24 = arith.constant 1 : index
    %c0_25 = arith.constant 0 : index
    %37 = vector.load %arg5[%c0_23, %c1_24, %c0_25] : memref<2x18x128xf32, #tpu.memory_space<vmem>>, vector<2x16x128xf32>
    %38 = vector.shape_cast %37 : vector<2x16x128xf32> to vector<32x128xf32>
    %39 = vector.extract_strided_slice %38 {offsets = [0, 8], sizes = [32, 120], strides = [1, 1]} : vector<32x128xf32> to vector<32x120xf32>
    %40 = vector.extract_strided_slice %38 {offsets = [0, 0], sizes = [32, 8], strides = [1, 1]} : vector<32x128xf32> to vector<32x8xf32>
    %41 = tpu.concatenate %39, %40 in 1 : vector<32x120xf32>, vector<32x8xf32> -> vector<32x128xf32>
    %42 = vector.extract_strided_slice %38 {offsets = [0, 120], sizes = [32, 8], strides = [1, 1]} : vector<32x128xf32> to vector<32x8xf32>
    %43 = vector.extract_strided_slice %38 {offsets = [0, 0], sizes = [32, 120], strides = [1, 1]} : vector<32x128xf32> to vector<32x120xf32>
    %44 = tpu.concatenate %42, %43 in 1 : vector<32x8xf32>, vector<32x120xf32> -> vector<32x128xf32>
    %45 = arith.select %2, %41, %44 : vector<32x128xi1>, vector<32x128xf32>
    %46 = arith.select %4, %44, %41 : vector<32x128xi1>, vector<32x128xf32>
    %47 = arith.truncf %45 : vector<32x128xf32> to vector<32x128xbf16>
    %c3 = arith.constant 3 : index
    %c0_26 = arith.constant 0 : index
    %c0_27 = arith.constant 0 : index
    %48 = vector.load %arg2[%c3, %c0_26, %c0_27] : memref<9x128x256xbf16, #tpu.memory_space<vmem>>, vector<1x128x256xbf16>
    %49 = vector.shape_cast %48 : vector<1x128x256xbf16> to vector<128x256xbf16>
    %cst_28 = arith.constant dense<0.000000e+00> : vector<32x256xf32>
    %50 = tpu.matmul %47, %49, %cst_28 {dimension_numbers = #tpu.dot_dimension_numbers<[1], [0], [0], [1], [0, 0, 1, 1], [], []>} : vector<32x128xbf16>, vector<128x256xbf16>, vector<32x256xf32> -> vector<32x256xf32>
    %51 = arith.addf %36, %50 : vector<32x256xf32>
    %52 = arith.truncf %38 : vector<32x128xf32> to vector<32x128xbf16>
    %c4 = arith.constant 4 : index
    %c0_29 = arith.constant 0 : index
    %c0_30 = arith.constant 0 : index
    %53 = vector.load %arg2[%c4, %c0_29, %c0_30] : memref<9x128x256xbf16, #tpu.memory_space<vmem>>, vector<1x128x256xbf16>
    %54 = vector.shape_cast %53 : vector<1x128x256xbf16> to vector<128x256xbf16>
    %cst_31 = arith.constant dense<0.000000e+00> : vector<32x256xf32>
    %55 = tpu.matmul %52, %54, %cst_31 {dimension_numbers = #tpu.dot_dimension_numbers<[1], [0], [0], [1], [0, 0, 1, 1], [], []>} : vector<32x128xbf16>, vector<128x256xbf16>, vector<32x256xf32> -> vector<32x256xf32>
    %56 = arith.addf %51, %55 : vector<32x256xf32>
    %57 = arith.truncf %46 : vector<32x128xf32> to vector<32x128xbf16>
    %c5 = arith.constant 5 : index
    %c0_32 = arith.constant 0 : index
    %c0_33 = arith.constant 0 : index
    %58 = vector.load %arg2[%c5, %c0_32, %c0_33] : memref<9x128x256xbf16, #tpu.memory_space<vmem>>, vector<1x128x256xbf16>
    %59 = vector.shape_cast %58 : vector<1x128x256xbf16> to vector<128x256xbf16>
    %cst_34 = arith.constant dense<0.000000e+00> : vector<32x256xf32>
    %60 = tpu.matmul %57, %59, %cst_34 {dimension_numbers = #tpu.dot_dimension_numbers<[1], [0], [0], [1], [0, 0, 1, 1], [], []>} : vector<32x128xbf16>, vector<128x256xbf16>, vector<32x256xf32> -> vector<32x256xf32>
    %61 = arith.addf %56, %60 : vector<32x256xf32>
    %c0_35 = arith.constant 0 : index
    %c2_36 = arith.constant 2 : index
    %c0_37 = arith.constant 0 : index
    %62 = vector.load %arg5[%c0_35, %c2_36, %c0_37] : memref<2x18x128xf32, #tpu.memory_space<vmem>>, vector<2x16x128xf32>
    %63 = vector.shape_cast %62 : vector<2x16x128xf32> to vector<32x128xf32>
    %64 = vector.extract_strided_slice %63 {offsets = [0, 8], sizes = [32, 120], strides = [1, 1]} : vector<32x128xf32> to vector<32x120xf32>
    %65 = vector.extract_strided_slice %63 {offsets = [0, 0], sizes = [32, 8], strides = [1, 1]} : vector<32x128xf32> to vector<32x8xf32>
    %66 = tpu.concatenate %64, %65 in 1 : vector<32x120xf32>, vector<32x8xf32> -> vector<32x128xf32>
    %67 = vector.extract_strided_slice %63 {offsets = [0, 120], sizes = [32, 8], strides = [1, 1]} : vector<32x128xf32> to vector<32x8xf32>
    %68 = vector.extract_strided_slice %63 {offsets = [0, 0], sizes = [32, 120], strides = [1, 1]} : vector<32x128xf32> to vector<32x120xf32>
    %69 = tpu.concatenate %67, %68 in 1 : vector<32x8xf32>, vector<32x120xf32> -> vector<32x128xf32>
    %70 = arith.select %2, %66, %69 : vector<32x128xi1>, vector<32x128xf32>
    %71 = arith.select %4, %69, %66 : vector<32x128xi1>, vector<32x128xf32>
    %72 = arith.truncf %70 : vector<32x128xf32> to vector<32x128xbf16>
    %c6 = arith.constant 6 : index
    %c0_38 = arith.constant 0 : index
    %c0_39 = arith.constant 0 : index
    %73 = vector.load %arg2[%c6, %c0_38, %c0_39] : memref<9x128x256xbf16, #tpu.memory_space<vmem>>, vector<1x128x256xbf16>
    %74 = vector.shape_cast %73 : vector<1x128x256xbf16> to vector<128x256xbf16>
    %cst_40 = arith.constant dense<0.000000e+00> : vector<32x256xf32>
    %75 = tpu.matmul %72, %74, %cst_40 {dimension_numbers = #tpu.dot_dimension_numbers<[1], [0], [0], [1], [0, 0, 1, 1], [], []>} : vector<32x128xbf16>, vector<128x256xbf16>, vector<32x256xf32> -> vector<32x256xf32>
    %76 = arith.addf %61, %75 : vector<32x256xf32>
    %77 = arith.truncf %63 : vector<32x128xf32> to vector<32x128xbf16>
    %c7 = arith.constant 7 : index
    %c0_41 = arith.constant 0 : index
    %c0_42 = arith.constant 0 : index
    %78 = vector.load %arg2[%c7, %c0_41, %c0_42] : memref<9x128x256xbf16, #tpu.memory_space<vmem>>, vector<1x128x256xbf16>
    %79 = vector.shape_cast %78 : vector<1x128x256xbf16> to vector<128x256xbf16>
    %cst_43 = arith.constant dense<0.000000e+00> : vector<32x256xf32>
    %80 = tpu.matmul %77, %79, %cst_43 {dimension_numbers = #tpu.dot_dimension_numbers<[1], [0], [0], [1], [0, 0, 1, 1], [], []>} : vector<32x128xbf16>, vector<128x256xbf16>, vector<32x256xf32> -> vector<32x256xf32>
    %81 = arith.addf %76, %80 : vector<32x256xf32>
    %82 = arith.truncf %71 : vector<32x128xf32> to vector<32x128xbf16>
    %c8 = arith.constant 8 : index
    %c0_44 = arith.constant 0 : index
    %c0_45 = arith.constant 0 : index
    %83 = vector.load %arg2[%c8, %c0_44, %c0_45] : memref<9x128x256xbf16, #tpu.memory_space<vmem>>, vector<1x128x256xbf16>
    %84 = vector.shape_cast %83 : vector<1x128x256xbf16> to vector<128x256xbf16>
    %cst_46 = arith.constant dense<0.000000e+00> : vector<32x256xf32>
    %85 = tpu.matmul %82, %84, %cst_46 {dimension_numbers = #tpu.dot_dimension_numbers<[1], [0], [0], [1], [0, 0, 1, 1], [], []>} : vector<32x128xbf16>, vector<128x256xbf16>, vector<32x256xf32> -> vector<32x256xf32>
    %86 = arith.addf %81, %85 : vector<32x256xf32>
    %87 = vector.shape_cast %86 : vector<32x256xf32> to vector<2x16x256xf32>
    %cst_47 = arith.constant dense<0.000000e+00> : vector<2x256xf32>
    %88 = vector.multi_reduction <add>, %87, %cst_47 [1] : vector<2x16x256xf32> to vector<2x256xf32>
    %89 = vector.shape_cast %88 : vector<2x256xf32> to vector<2x1x256xf32>
    %90 = vector.extract_strided_slice %89 {offsets = [0, 0, 0], sizes = [2, 1, 128], strides = [1, 1, 1]} : vector<2x1x256xf32> to vector<2x1x128xf32>
    %91 = vector.extract_strided_slice %90 {offsets = [0, 0, 8], sizes = [2, 1, 120], strides = [1, 1, 1]} : vector<2x1x128xf32> to vector<2x1x120xf32>
    %92 = vector.extract_strided_slice %90 {offsets = [0, 0, 0], sizes = [2, 1, 8], strides = [1, 1, 1]} : vector<2x1x128xf32> to vector<2x1x8xf32>
    %93 = tpu.concatenate %91, %92 in 2 : vector<2x1x120xf32>, vector<2x1x8xf32> -> vector<2x1x128xf32>
    %94 = arith.addf %90, %93 : vector<2x1x128xf32>
    %95 = vector.extract_strided_slice %94 {offsets = [0, 0, 16], sizes = [2, 1, 112], strides = [1, 1, 1]} : vector<2x1x128xf32> to vector<2x1x112xf32>
    %96 = vector.extract_strided_slice %94 {offsets = [0, 0, 0], sizes = [2, 1, 16], strides = [1, 1, 1]} : vector<2x1x128xf32> to vector<2x1x16xf32>
    %97 = tpu.concatenate %95, %96 in 2 : vector<2x1x112xf32>, vector<2x1x16xf32> -> vector<2x1x128xf32>
    %98 = arith.addf %94, %97 : vector<2x1x128xf32>
    %99 = vector.extract_strided_slice %98 {offsets = [0, 0, 32], sizes = [2, 1, 96], strides = [1, 1, 1]} : vector<2x1x128xf32> to vector<2x1x96xf32>
    %100 = vector.extract_strided_slice %98 {offsets = [0, 0, 0], sizes = [2, 1, 32], strides = [1, 1, 1]} : vector<2x1x128xf32> to vector<2x1x32xf32>
    %101 = tpu.concatenate %99, %100 in 2 : vector<2x1x96xf32>, vector<2x1x32xf32> -> vector<2x1x128xf32>
    %102 = arith.addf %98, %101 : vector<2x1x128xf32>
    %103 = vector.extract_strided_slice %102 {offsets = [0, 0, 64], sizes = [2, 1, 64], strides = [1, 1, 1]} : vector<2x1x128xf32> to vector<2x1x64xf32>
    %104 = vector.extract_strided_slice %102 {offsets = [0, 0, 0], sizes = [2, 1, 64], strides = [1, 1, 1]} : vector<2x1x128xf32> to vector<2x1x64xf32>
    %105 = tpu.concatenate %103, %104 in 2 : vector<2x1x64xf32>, vector<2x1x64xf32> -> vector<2x1x128xf32>
    %106 = arith.addf %102, %105 : vector<2x1x128xf32>
    %107 = vector.extract_strided_slice %89 {offsets = [0, 0, 128], sizes = [2, 1, 128], strides = [1, 1, 1]} : vector<2x1x256xf32> to vector<2x1x128xf32>
    %108 = vector.extract_strided_slice %107 {offsets = [0, 0, 8], sizes = [2, 1, 120], strides = [1, 1, 1]} : vector<2x1x128xf32> to vector<2x1x120xf32>
    %109 = vector.extract_strided_slice %107 {offsets = [0, 0, 0], sizes = [2, 1, 8], strides = [1, 1, 1]} : vector<2x1x128xf32> to vector<2x1x8xf32>
    %110 = tpu.concatenate %108, %109 in 2 : vector<2x1x120xf32>, vector<2x1x8xf32> -> vector<2x1x128xf32>
    %111 = arith.addf %107, %110 : vector<2x1x128xf32>
    %112 = vector.extract_strided_slice %111 {offsets = [0, 0, 16], sizes = [2, 1, 112], strides = [1, 1, 1]} : vector<2x1x128xf32> to vector<2x1x112xf32>
    %113 = vector.extract_strided_slice %111 {offsets = [0, 0, 0], sizes = [2, 1, 16], strides = [1, 1, 1]} : vector<2x1x128xf32> to vector<2x1x16xf32>
    %114 = tpu.concatenate %112, %113 in 2 : vector<2x1x112xf32>, vector<2x1x16xf32> -> vector<2x1x128xf32>
    %115 = arith.addf %111, %114 : vector<2x1x128xf32>
    %116 = vector.extract_strided_slice %115 {offsets = [0, 0, 32], sizes = [2, 1, 96], strides = [1, 1, 1]} : vector<2x1x128xf32> to vector<2x1x96xf32>
    %117 = vector.extract_strided_slice %115 {offsets = [0, 0, 0], sizes = [2, 1, 32], strides = [1, 1, 1]} : vector<2x1x128xf32> to vector<2x1x32xf32>
    %118 = tpu.concatenate %116, %117 in 2 : vector<2x1x96xf32>, vector<2x1x32xf32> -> vector<2x1x128xf32>
    %119 = arith.addf %115, %118 : vector<2x1x128xf32>
    %120 = vector.extract_strided_slice %119 {offsets = [0, 0, 64], sizes = [2, 1, 64], strides = [1, 1, 1]} : vector<2x1x128xf32> to vector<2x1x64xf32>
    %121 = vector.extract_strided_slice %119 {offsets = [0, 0, 0], sizes = [2, 1, 64], strides = [1, 1, 1]} : vector<2x1x128xf32> to vector<2x1x64xf32>
    %122 = tpu.concatenate %120, %121 in 2 : vector<2x1x64xf32>, vector<2x1x64xf32> -> vector<2x1x128xf32>
    %123 = arith.addf %119, %122 : vector<2x1x128xf32>
    %124 = tpu.concatenate %106, %123 in 2 : vector<2x1x128xf32>, vector<2x1x128xf32> -> vector<2x1x256xf32>
    %cst_48 = arith.constant 3.906250e-03 : f32
    %125 = vector.broadcast %cst_48 : f32 to vector<2x1x256xf32>
    %126 = arith.mulf %124, %125 : vector<2x1x256xf32>
    %127 = vector.broadcast %126 : vector<2x1x256xf32> to vector<2x16x256xf32>
    %128 = arith.subf %87, %127 : vector<2x16x256xf32>
    %129 = arith.mulf %128, %128 : vector<2x16x256xf32>
    %cst_49 = arith.constant dense<0.000000e+00> : vector<2x256xf32>
    %130 = vector.multi_reduction <add>, %129, %cst_49 [1] : vector<2x16x256xf32> to vector<2x256xf32>
    %131 = vector.shape_cast %130 : vector<2x256xf32> to vector<2x1x256xf32>
    %132 = vector.extract_strided_slice %131 {offsets = [0, 0, 0], sizes = [2, 1, 128], strides = [1, 1, 1]} : vector<2x1x256xf32> to vector<2x1x128xf32>
    %133 = vector.extract_strided_slice %132 {offsets = [0, 0, 8], sizes = [2, 1, 120], strides = [1, 1, 1]} : vector<2x1x128xf32> to vector<2x1x120xf32>
    %134 = vector.extract_strided_slice %132 {offsets = [0, 0, 0], sizes = [2, 1, 8], strides = [1, 1, 1]} : vector<2x1x128xf32> to vector<2x1x8xf32>
    %135 = tpu.concatenate %133, %134 in 2 : vector<2x1x120xf32>, vector<2x1x8xf32> -> vector<2x1x128xf32>
    %136 = arith.addf %132, %135 : vector<2x1x128xf32>
    %137 = vector.extract_strided_slice %136 {offsets = [0, 0, 16], sizes = [2, 1, 112], strides = [1, 1, 1]} : vector<2x1x128xf32> to vector<2x1x112xf32>
    %138 = vector.extract_strided_slice %136 {offsets = [0, 0, 0], sizes = [2, 1, 16], strides = [1, 1, 1]} : vector<2x1x128xf32> to vector<2x1x16xf32>
    %139 = tpu.concatenate %137, %138 in 2 : vector<2x1x112xf32>, vector<2x1x16xf32> -> vector<2x1x128xf32>
    %140 = arith.addf %136, %139 : vector<2x1x128xf32>
    %141 = vector.extract_strided_slice %140 {offsets = [0, 0, 32], sizes = [2, 1, 96], strides = [1, 1, 1]} : vector<2x1x128xf32> to vector<2x1x96xf32>
    %142 = vector.extract_strided_slice %140 {offsets = [0, 0, 0], sizes = [2, 1, 32], strides = [1, 1, 1]} : vector<2x1x128xf32> to vector<2x1x32xf32>
    %143 = tpu.concatenate %141, %142 in 2 : vector<2x1x96xf32>, vector<2x1x32xf32> -> vector<2x1x128xf32>
    %144 = arith.addf %140, %143 : vector<2x1x128xf32>
    %145 = vector.extract_strided_slice %144 {offsets = [0, 0, 64], sizes = [2, 1, 64], strides = [1, 1, 1]} : vector<2x1x128xf32> to vector<2x1x64xf32>
    %146 = vector.extract_strided_slice %144 {offsets = [0, 0, 0], sizes = [2, 1, 64], strides = [1, 1, 1]} : vector<2x1x128xf32> to vector<2x1x64xf32>
    %147 = tpu.concatenate %145, %146 in 2 : vector<2x1x64xf32>, vector<2x1x64xf32> -> vector<2x1x128xf32>
    %148 = arith.addf %144, %147 : vector<2x1x128xf32>
    %149 = vector.extract_strided_slice %131 {offsets = [0, 0, 128], sizes = [2, 1, 128], strides = [1, 1, 1]} : vector<2x1x256xf32> to vector<2x1x128xf32>
    %150 = vector.extract_strided_slice %149 {offsets = [0, 0, 8], sizes = [2, 1, 120], strides = [1, 1, 1]} : vector<2x1x128xf32> to vector<2x1x120xf32>
    %151 = vector.extract_strided_slice %149 {offsets = [0, 0, 0], sizes = [2, 1, 8], strides = [1, 1, 1]} : vector<2x1x128xf32> to vector<2x1x8xf32>
    %152 = tpu.concatenate %150, %151 in 2 : vector<2x1x120xf32>, vector<2x1x8xf32> -> vector<2x1x128xf32>
    %153 = arith.addf %149, %152 : vector<2x1x128xf32>
    %154 = vector.extract_strided_slice %153 {offsets = [0, 0, 16], sizes = [2, 1, 112], strides = [1, 1, 1]} : vector<2x1x128xf32> to vector<2x1x112xf32>
    %155 = vector.extract_strided_slice %153 {offsets = [0, 0, 0], sizes = [2, 1, 16], strides = [1, 1, 1]} : vector<2x1x128xf32> to vector<2x1x16xf32>
    %156 = tpu.concatenate %154, %155 in 2 : vector<2x1x112xf32>, vector<2x1x16xf32> -> vector<2x1x128xf32>
    %157 = arith.addf %153, %156 : vector<2x1x128xf32>
    %158 = vector.extract_strided_slice %157 {offsets = [0, 0, 32], sizes = [2, 1, 96], strides = [1, 1, 1]} : vector<2x1x128xf32> to vector<2x1x96xf32>
    %159 = vector.extract_strided_slice %157 {offsets = [0, 0, 0], sizes = [2, 1, 32], strides = [1, 1, 1]} : vector<2x1x128xf32> to vector<2x1x32xf32>
    %160 = tpu.concatenate %158, %159 in 2 : vector<2x1x96xf32>, vector<2x1x32xf32> -> vector<2x1x128xf32>
    %161 = arith.addf %157, %160 : vector<2x1x128xf32>
    %162 = vector.extract_strided_slice %161 {offsets = [0, 0, 64], sizes = [2, 1, 64], strides = [1, 1, 1]} : vector<2x1x128xf32> to vector<2x1x64xf32>
    %163 = vector.extract_strided_slice %161 {offsets = [0, 0, 0], sizes = [2, 1, 64], strides = [1, 1, 1]} : vector<2x1x128xf32> to vector<2x1x64xf32>
    %164 = tpu.concatenate %162, %163 in 2 : vector<2x1x64xf32>, vector<2x1x64xf32> -> vector<2x1x128xf32>
    %165 = arith.addf %161, %164 : vector<2x1x128xf32>
    %166 = tpu.concatenate %148, %165 in 2 : vector<2x1x128xf32>, vector<2x1x128xf32> -> vector<2x1x256xf32>
    %cst_50 = arith.constant 3.906250e-03 : f32
    %167 = vector.broadcast %cst_50 : f32 to vector<2x1x256xf32>
    %168 = arith.mulf %166, %167 : vector<2x1x256xf32>
    %cst_51 = arith.constant 9.99999974E-6 : f32
    %169 = vector.broadcast %cst_51 : f32 to vector<2x1x256xf32>
    %170 = arith.addf %168, %169 : vector<2x1x256xf32>
    %171 = math.rsqrt %170 : vector<2x1x256xf32>
    %172 = vector.broadcast %171 : vector<2x1x256xf32> to vector<2x16x256xf32>
    %173 = arith.mulf %128, %172 : vector<2x16x256xf32>
    %174 = vector.shape_cast %173 : vector<2x16x256xf32> to vector<32x256xf32>
    %175 = vector.extract_strided_slice %174 {offsets = [0, 128], sizes = [32, 128], strides = [1, 1]} : vector<32x256xf32> to vector<32x128xf32>
    %cst_52 = arith.constant 0.000000e+00 : f32
    %176 = vector.broadcast %cst_52 : f32 to vector<32x128xf32>
    %177 = arith.subf %176, %175 : vector<32x128xf32>
    %178 = math.exp %177 : vector<32x128xf32>
    %cst_53 = arith.constant 1.000000e+00 : f32
    %179 = vector.broadcast %cst_53 : f32 to vector<32x128xf32>
    %180 = arith.addf %179, %178 : vector<32x128xf32>
    %181 = tpu.reciprocal %180 {approx = true} : vector<32x128xf32> -> vector<32x128xf32>
    %182 = vector.extract_strided_slice %174 {offsets = [0, 0], sizes = [32, 128], strides = [1, 1]} : vector<32x256xf32> to vector<32x128xf32>
    %183 = arith.mulf %182, %181 : vector<32x128xf32>
    %184 = vector.shape_cast %183 : vector<32x128xf32> to vector<2x16x128xf32>
    %c0_54 = arith.constant 0 : index
    %c1_55 = arith.constant 1 : index
    %c0_56 = arith.constant 0 : index
    %185 = vector.load %arg5[%c0_54, %c1_55, %c0_56] : memref<2x18x128xf32, #tpu.memory_space<vmem>>, vector<2x16x128xf32>
    tpu.vector_store %arg5[%c0_54, %c1_55, %c0_56], %184 {strides = array<i32>} : memref<2x18x128xf32, #tpu.memory_space<vmem>>, vector<2x16x128xf32>,
    %186 = vector.extract_strided_slice %184 {offsets = [0, 1, 0], sizes = [2, 1, 128], strides = [1, 1, 1]} : vector<2x16x128xf32> to vector<2x1x128xf32>
    %c0_57 = arith.constant 0 : index
    %c0_58 = arith.constant 0 : index
    %c0_59 = arith.constant 0 : index
    %187 = vector.load %arg5[%c0_57, %c0_58, %c0_59] : memref<2x18x128xf32, #tpu.memory_space<vmem>>, vector<2x1x128xf32>
    tpu.vector_store %arg5[%c0_57, %c0_58, %c0_59], %186 {strides = array<i32>} : memref<2x18x128xf32, #tpu.memory_space<vmem>>, vector<2x1x128xf32>,
    %188 = vector.extract_strided_slice %184 {offsets = [0, 14, 0], sizes = [2, 1, 128], strides = [1, 1, 1]} : vector<2x16x128xf32> to vector<2x1x128xf32>
    %c0_60 = arith.constant 0 : index
    %c17_61 = arith.constant 17 : index
    %c0_62 = arith.constant 0 : index
    %189 = vector.load %arg5[%c0_60, %c17_61, %c0_62] : memref<2x18x128xf32, #tpu.memory_space<vmem>>, vector<2x1x128xf32>
    tpu.vector_store %arg5[%c0_60, %c17_61, %c0_62], %188 {strides = array<i32>} : memref<2x18x128xf32, #tpu.memory_space<vmem>>, vector<2x1x128xf32>,
    %cst_63 = arith.constant 0.000000e+00 : f32
    %190 = vector.broadcast %cst_63 : f32 to vector<32x128xf32>
    %c0_64 = arith.constant 0 : index
    %c0_65 = arith.constant 0 : index
    %c0_66 = arith.constant 0 : index
    %191 = vector.load %arg5[%c0_64, %c0_65, %c0_66] : memref<2x18x128xf32, #tpu.memory_space<vmem>>, vector<2x16x128xf32>
    %192 = vector.shape_cast %191 : vector<2x16x128xf32> to vector<32x128xf32>
    %193 = vector.extract_strided_slice %192 {offsets = [0, 8], sizes = [32, 120], strides = [1, 1]} : vector<32x128xf32> to vector<32x120xf32>
    %194 = vector.extract_strided_slice %192 {offsets = [0, 0], sizes = [32, 8], strides = [1, 1]} : vector<32x128xf32> to vector<32x8xf32>
    %195 = tpu.concatenate %193, %194 in 1 : vector<32x120xf32>, vector<32x8xf32> -> vector<32x128xf32>
    %196 = vector.extract_strided_slice %192 {offsets = [0, 120], sizes = [32, 8], strides = [1, 1]} : vector<32x128xf32> to vector<32x8xf32>
    %197 = vector.extract_strided_slice %192 {offsets = [0, 0], sizes = [32, 120], strides = [1, 1]} : vector<32x128xf32> to vector<32x120xf32>
    %198 = tpu.concatenate %196, %197 in 1 : vector<32x8xf32>, vector<32x120xf32> -> vector<32x128xf32>
    %199 = arith.select %2, %195, %198 : vector<32x128xi1>, vector<32x128xf32>
    %200 = arith.select %4, %198, %195 : vector<32x128xi1>, vector<32x128xf32>
    %201 = arith.truncf %199 : vector<32x128xf32> to vector<32x128xbf16>
    %c0_67 = arith.constant 0 : index
    %c0_68 = arith.constant 0 : index
    %c0_69 = arith.constant 0 : index
    %202 = vector.load %arg3[%c0_67, %c0_68, %c0_69] : memref<9x128x128xbf16, #tpu.memory_space<vmem>>, vector<1x128x128xbf16>
    %203 = vector.shape_cast %202 : vector<1x128x128xbf16> to vector<128x128xbf16>
    %cst_70 = arith.constant dense<0.000000e+00> : vector<32x128xf32>
    %204 = tpu.matmul %201, %203, %cst_70 {dimension_numbers = #tpu.dot_dimension_numbers<[1], [0], [0], [1], [0, 0, 1, 1], [], []>} : vector<32x128xbf16>, vector<128x128xbf16>, vector<32x128xf32> -> vector<32x128xf32>
    %205 = arith.addf %190, %204 : vector<32x128xf32>
    %206 = arith.truncf %192 : vector<32x128xf32> to vector<32x128xbf16>
    %c1_71 = arith.constant 1 : index
    %c0_72 = arith.constant 0 : index
    %c0_73 = arith.constant 0 : index
    %207 = vector.load %arg3[%c1_71, %c0_72, %c0_73] : memref<9x128x128xbf16, #tpu.memory_space<vmem>>, vector<1x128x128xbf16>
    %208 = vector.shape_cast %207 : vector<1x128x128xbf16> to vector<128x128xbf16>
    %cst_74 = arith.constant dense<0.000000e+00> : vector<32x128xf32>
    %209 = tpu.matmul %206, %208, %cst_74 {dimension_numbers = #tpu.dot_dimension_numbers<[1], [0], [0], [1], [0, 0, 1, 1], [], []>} : vector<32x128xbf16>, vector<128x128xbf16>, vector<32x128xf32> -> vector<32x128xf32>
    %210 = arith.addf %205, %209 : vector<32x128xf32>
    %211 = arith.truncf %200 : vector<32x128xf32> to vector<32x128xbf16>
    %c2_75 = arith.constant 2 : index
    %c0_76 = arith.constant 0 : index
    %c0_77 = arith.constant 0 : index
    %212 = vector.load %arg3[%c2_75, %c0_76, %c0_77] : memref<9x128x128xbf16, #tpu.memory_space<vmem>>, vector<1x128x128xbf16>
    %213 = vector.shape_cast %212 : vector<1x128x128xbf16> to vector<128x128xbf16>
    %cst_78 = arith.constant dense<0.000000e+00> : vector<32x128xf32>
    %214 = tpu.matmul %211, %213, %cst_78 {dimension_numbers = #tpu.dot_dimension_numbers<[1], [0], [0], [1], [0, 0, 1, 1], [], []>} : vector<32x128xbf16>, vector<128x128xbf16>, vector<32x128xf32> -> vector<32x128xf32>
    %215 = arith.addf %210, %214 : vector<32x128xf32>
    %c0_79 = arith.constant 0 : index
    %c1_80 = arith.constant 1 : index
    %c0_81 = arith.constant 0 : index
    %216 = vector.load %arg5[%c0_79, %c1_80, %c0_81] : memref<2x18x128xf32, #tpu.memory_space<vmem>>, vector<2x16x128xf32>
    %217 = vector.shape_cast %216 : vector<2x16x128xf32> to vector<32x128xf32>
    %218 = vector.extract_strided_slice %217 {offsets = [0, 8], sizes = [32, 120], strides = [1, 1]} : vector<32x128xf32> to vector<32x120xf32>
    %219 = vector.extract_strided_slice %217 {offsets = [0, 0], sizes = [32, 8], strides = [1, 1]} : vector<32x128xf32> to vector<32x8xf32>
    %220 = tpu.concatenate %218, %219 in 1 : vector<32x120xf32>, vector<32x8xf32> -> vector<32x128xf32>
    %221 = vector.extract_strided_slice %217 {offsets = [0, 120], sizes = [32, 8], strides = [1, 1]} : vector<32x128xf32> to vector<32x8xf32>
    %222 = vector.extract_strided_slice %217 {offsets = [0, 0], sizes = [32, 120], strides = [1, 1]} : vector<32x128xf32> to vector<32x120xf32>
    %223 = tpu.concatenate %221, %222 in 1 : vector<32x8xf32>, vector<32x120xf32> -> vector<32x128xf32>
    %224 = arith.select %2, %220, %223 : vector<32x128xi1>, vector<32x128xf32>
    %225 = arith.select %4, %223, %220 : vector<32x128xi1>, vector<32x128xf32>
    %226 = arith.truncf %224 : vector<32x128xf32> to vector<32x128xbf16>
    %c3_82 = arith.constant 3 : index
    %c0_83 = arith.constant 0 : index
    %c0_84 = arith.constant 0 : index
    %227 = vector.load %arg3[%c3_82, %c0_83, %c0_84] : memref<9x128x128xbf16, #tpu.memory_space<vmem>>, vector<1x128x128xbf16>
    %228 = vector.shape_cast %227 : vector<1x128x128xbf16> to vector<128x128xbf16>
    %cst_85 = arith.constant dense<0.000000e+00> : vector<32x128xf32>
    %229 = tpu.matmul %226, %228, %cst_85 {dimension_numbers = #tpu.dot_dimension_numbers<[1], [0], [0], [1], [0, 0, 1, 1], [], []>} : vector<32x128xbf16>, vector<128x128xbf16>, vector<32x128xf32> -> vector<32x128xf32>
    %230 = arith.addf %215, %229 : vector<32x128xf32>
    %231 = arith.truncf %217 : vector<32x128xf32> to vector<32x128xbf16>
    %c4_86 = arith.constant 4 : index
    %c0_87 = arith.constant 0 : index
    %c0_88 = arith.constant 0 : index
    %232 = vector.load %arg3[%c4_86, %c0_87, %c0_88] : memref<9x128x128xbf16, #tpu.memory_space<vmem>>, vector<1x128x128xbf16>
    %233 = vector.shape_cast %232 : vector<1x128x128xbf16> to vector<128x128xbf16>
    %cst_89 = arith.constant dense<0.000000e+00> : vector<32x128xf32>
    %234 = tpu.matmul %231, %233, %cst_89 {dimension_numbers = #tpu.dot_dimension_numbers<[1], [0], [0], [1], [0, 0, 1, 1], [], []>} : vector<32x128xbf16>, vector<128x128xbf16>, vector<32x128xf32> -> vector<32x128xf32>
    %235 = arith.addf %230, %234 : vector<32x128xf32>
    %236 = arith.truncf %225 : vector<32x128xf32> to vector<32x128xbf16>
    %c5_90 = arith.constant 5 : index
    %c0_91 = arith.constant 0 : index
    %c0_92 = arith.constant 0 : index
    %237 = vector.load %arg3[%c5_90, %c0_91, %c0_92] : memref<9x128x128xbf16, #tpu.memory_space<vmem>>, vector<1x128x128xbf16>
    %238 = vector.shape_cast %237 : vector<1x128x128xbf16> to vector<128x128xbf16>
    %cst_93 = arith.constant dense<0.000000e+00> : vector<32x128xf32>
    %239 = tpu.matmul %236, %238, %cst_93 {dimension_numbers = #tpu.dot_dimension_numbers<[1], [0], [0], [1], [0, 0, 1, 1], [], []>} : vector<32x128xbf16>, vector<128x128xbf16>, vector<32x128xf32> -> vector<32x128xf32>
    %240 = arith.addf %235, %239 : vector<32x128xf32>
    %c0_94 = arith.constant 0 : index
    %c2_95 = arith.constant 2 : index
    %c0_96 = arith.constant 0 : index
    %241 = vector.load %arg5[%c0_94, %c2_95, %c0_96] : memref<2x18x128xf32, #tpu.memory_space<vmem>>, vector<2x16x128xf32>
    %242 = vector.shape_cast %241 : vector<2x16x128xf32> to vector<32x128xf32>
    %243 = vector.extract_strided_slice %242 {offsets = [0, 8], sizes = [32, 120], strides = [1, 1]} : vector<32x128xf32> to vector<32x120xf32>
    %244 = vector.extract_strided_slice %242 {offsets = [0, 0], sizes = [32, 8], strides = [1, 1]} : vector<32x128xf32> to vector<32x8xf32>
    %245 = tpu.concatenate %243, %244 in 1 : vector<32x120xf32>, vector<32x8xf32> -> vector<32x128xf32>
    %246 = vector.extract_strided_slice %242 {offsets = [0, 120], sizes = [32, 8], strides = [1, 1]} : vector<32x128xf32> to vector<32x8xf32>
    %247 = vector.extract_strided_slice %242 {offsets = [0, 0], sizes = [32, 120], strides = [1, 1]} : vector<32x128xf32> to vector<32x120xf32>
    %248 = tpu.concatenate %246, %247 in 1 : vector<32x8xf32>, vector<32x120xf32> -> vector<32x128xf32>
    %249 = arith.select %2, %245, %248 : vector<32x128xi1>, vector<32x128xf32>
    %250 = arith.select %4, %248, %245 : vector<32x128xi1>, vector<32x128xf32>
    %251 = arith.truncf %249 : vector<32x128xf32> to vector<32x128xbf16>
    %c6_97 = arith.constant 6 : index
    %c0_98 = arith.constant 0 : index
    %c0_99 = arith.constant 0 : index
    %252 = vector.load %arg3[%c6_97, %c0_98, %c0_99] : memref<9x128x128xbf16, #tpu.memory_space<vmem>>, vector<1x128x128xbf16>
    %253 = vector.shape_cast %252 : vector<1x128x128xbf16> to vector<128x128xbf16>
    %cst_100 = arith.constant dense<0.000000e+00> : vector<32x128xf32>
    %254 = tpu.matmul %251, %253, %cst_100 {dimension_numbers = #tpu.dot_dimension_numbers<[1], [0], [0], [1], [0, 0, 1, 1], [], []>} : vector<32x128xbf16>, vector<128x128xbf16>, vector<32x128xf32> -> vector<32x128xf32>
    %255 = arith.addf %240, %254 : vector<32x128xf32>
    %256 = arith.truncf %242 : vector<32x128xf32> to vector<32x128xbf16>
    %c7_101 = arith.constant 7 : index
    %c0_102 = arith.constant 0 : index
    %c0_103 = arith.constant 0 : index
    %257 = vector.load %arg3[%c7_101, %c0_102, %c0_103] : memref<9x128x128xbf16, #tpu.memory_space<vmem>>, vector<1x128x128xbf16>
    %258 = vector.shape_cast %257 : vector<1x128x128xbf16> to vector<128x128xbf16>
    %cst_104 = arith.constant dense<0.000000e+00> : vector<32x128xf32>
    %259 = tpu.matmul %256, %258, %cst_104 {dimension_numbers = #tpu.dot_dimension_numbers<[1], [0], [0], [1], [0, 0, 1, 1], [], []>} : vector<32x128xbf16>, vector<128x128xbf16>, vector<32x128xf32> -> vector<32x128xf32>
    %260 = arith.addf %255, %259 : vector<32x128xf32>
    %261 = arith.truncf %250 : vector<32x128xf32> to vector<32x128xbf16>
    %c8_105 = arith.constant 8 : index
    %c0_106 = arith.constant 0 : index
    %c0_107 = arith.constant 0 : index
    %262 = vector.load %arg3[%c8_105, %c0_106, %c0_107] : memref<9x128x128xbf16, #tpu.memory_space<vmem>>, vector<1x128x128xbf16>
    %263 = vector.shape_cast %262 : vector<1x128x128xbf16> to vector<128x128xbf16>
    %cst_108 = arith.constant dense<0.000000e+00> : vector<32x128xf32>
    %264 = tpu.matmul %261, %263, %cst_108 {dimension_numbers = #tpu.dot_dimension_numbers<[1], [0], [0], [1], [0, 0, 1, 1], [], []>} : vector<32x128xbf16>, vector<128x128xbf16>, vector<32x128xf32> -> vector<32x128xf32>
    %265 = arith.addf %260, %264 : vector<32x128xf32>
    %266 = vector.shape_cast %265 : vector<32x128xf32> to vector<2x16x128xf32>
    %cst_109 = arith.constant dense<0.000000e+00> : vector<2x128xf32>
    %267 = vector.multi_reduction <add>, %266, %cst_109 [1] : vector<2x16x128xf32> to vector<2x128xf32>
    %268 = vector.shape_cast %267 : vector<2x128xf32> to vector<2x1x128xf32>
    %269 = vector.extract_strided_slice %268 {offsets = [0, 0, 8], sizes = [2, 1, 120], strides = [1, 1, 1]} : vector<2x1x128xf32> to vector<2x1x120xf32>
    %270 = vector.extract_strided_slice %268 {offsets = [0, 0, 0], sizes = [2, 1, 8], strides = [1, 1, 1]} : vector<2x1x128xf32> to vector<2x1x8xf32>
    %271 = tpu.concatenate %269, %270 in 2 : vector<2x1x120xf32>, vector<2x1x8xf32> -> vector<2x1x128xf32>
    %272 = arith.addf %268, %271 : vector<2x1x128xf32>
    %273 = vector.extract_strided_slice %272 {offsets = [0, 0, 16], sizes = [2, 1, 112], strides = [1, 1, 1]} : vector<2x1x128xf32> to vector<2x1x112xf32>
    %274 = vector.extract_strided_slice %272 {offsets = [0, 0, 0], sizes = [2, 1, 16], strides = [1, 1, 1]} : vector<2x1x128xf32> to vector<2x1x16xf32>
    %275 = tpu.concatenate %273, %274 in 2 : vector<2x1x112xf32>, vector<2x1x16xf32> -> vector<2x1x128xf32>
    %276 = arith.addf %272, %275 : vector<2x1x128xf32>
    %277 = vector.extract_strided_slice %276 {offsets = [0, 0, 32], sizes = [2, 1, 96], strides = [1, 1, 1]} : vector<2x1x128xf32> to vector<2x1x96xf32>
    %278 = vector.extract_strided_slice %276 {offsets = [0, 0, 0], sizes = [2, 1, 32], strides = [1, 1, 1]} : vector<2x1x128xf32> to vector<2x1x32xf32>
    %279 = tpu.concatenate %277, %278 in 2 : vector<2x1x96xf32>, vector<2x1x32xf32> -> vector<2x1x128xf32>
    %280 = arith.addf %276, %279 : vector<2x1x128xf32>
    %281 = vector.extract_strided_slice %280 {offsets = [0, 0, 64], sizes = [2, 1, 64], strides = [1, 1, 1]} : vector<2x1x128xf32> to vector<2x1x64xf32>
    %282 = vector.extract_strided_slice %280 {offsets = [0, 0, 0], sizes = [2, 1, 64], strides = [1, 1, 1]} : vector<2x1x128xf32> to vector<2x1x64xf32>
    %283 = tpu.concatenate %281, %282 in 2 : vector<2x1x64xf32>, vector<2x1x64xf32> -> vector<2x1x128xf32>
    %284 = arith.addf %280, %283 : vector<2x1x128xf32>
    %cst_110 = arith.constant 3.906250e-03 : f32
    %285 = vector.broadcast %cst_110 : f32 to vector<2x1x128xf32>
    %286 = arith.mulf %284, %285 : vector<2x1x128xf32>
    %287 = vector.broadcast %286 : vector<2x1x128xf32> to vector<2x16x128xf32>
    %288 = arith.subf %266, %287 : vector<2x16x128xf32>
    %289 = arith.mulf %288, %288 : vector<2x16x128xf32>
    %cst_111 = arith.constant dense<0.000000e+00> : vector<2x128xf32>
    %290 = vector.multi_reduction <add>, %289, %cst_111 [1] : vector<2x16x128xf32> to vector<2x128xf32>
    %291 = vector.shape_cast %290 : vector<2x128xf32> to vector<2x1x128xf32>
    %292 = vector.extract_strided_slice %291 {offsets = [0, 0, 8], sizes = [2, 1, 120], strides = [1, 1, 1]} : vector<2x1x128xf32> to vector<2x1x120xf32>
    %293 = vector.extract_strided_slice %291 {offsets = [0, 0, 0], sizes = [2, 1, 8], strides = [1, 1, 1]} : vector<2x1x128xf32> to vector<2x1x8xf32>
    %294 = tpu.concatenate %292, %293 in 2 : vector<2x1x120xf32>, vector<2x1x8xf32> -> vector<2x1x128xf32>
    %295 = arith.addf %291, %294 : vector<2x1x128xf32>
    %296 = vector.extract_strided_slice %295 {offsets = [0, 0, 16], sizes = [2, 1, 112], strides = [1, 1, 1]} : vector<2x1x128xf32> to vector<2x1x112xf32>
    %297 = vector.extract_strided_slice %295 {offsets = [0, 0, 0], sizes = [2, 1, 16], strides = [1, 1, 1]} : vector<2x1x128xf32> to vector<2x1x16xf32>
    %298 = tpu.concatenate %296, %297 in 2 : vector<2x1x112xf32>, vector<2x1x16xf32> -> vector<2x1x128xf32>
    %299 = arith.addf %295, %298 : vector<2x1x128xf32>
    %300 = vector.extract_strided_slice %299 {offsets = [0, 0, 32], sizes = [2, 1, 96], strides = [1, 1, 1]} : vector<2x1x128xf32> to vector<2x1x96xf32>
    %301 = vector.extract_strided_slice %299 {offsets = [0, 0, 0], sizes = [2, 1, 32], strides = [1, 1, 1]} : vector<2x1x128xf32> to vector<2x1x32xf32>
    %302 = tpu.concatenate %300, %301 in 2 : vector<2x1x96xf32>, vector<2x1x32xf32> -> vector<2x1x128xf32>
    %303 = arith.addf %299, %302 : vector<2x1x128xf32>
    %304 = vector.extract_strided_slice %303 {offsets = [0, 0, 64], sizes = [2, 1, 64], strides = [1, 1, 1]} : vector<2x1x128xf32> to vector<2x1x64xf32>
    %305 = vector.extract_strided_slice %303 {offsets = [0, 0, 0], sizes = [2, 1, 64], strides = [1, 1, 1]} : vector<2x1x128xf32> to vector<2x1x64xf32>
    %306 = tpu.concatenate %304, %305 in 2 : vector<2x1x64xf32>, vector<2x1x64xf32> -> vector<2x1x128xf32>
    %307 = arith.addf %303, %306 : vector<2x1x128xf32>
    %cst_112 = arith.constant 3.906250e-03 : f32
    %308 = vector.broadcast %cst_112 : f32 to vector<2x1x128xf32>
    %309 = arith.mulf %307, %308 : vector<2x1x128xf32>
    %cst_113 = arith.constant 9.99999974E-6 : f32
    %310 = vector.broadcast %cst_113 : f32 to vector<2x1x128xf32>
    %311 = arith.addf %309, %310 : vector<2x1x128xf32>
    %312 = math.rsqrt %311 : vector<2x1x128xf32>
    %313 = vector.broadcast %312 : vector<2x1x128xf32> to vector<2x16x128xf32>
    %314 = arith.mulf %288, %313 : vector<2x16x128xf32>
    %315 = vector.shape_cast %314 : vector<2x16x128xf32> to vector<32x128xf32>
    %316 = vector.shape_cast %5 : vector<2x16x128xf32> to vector<32x128xf32>
    %317 = arith.addf %315, %316 : vector<32x128xf32>
    %318 = vector.shape_cast %317 : vector<32x128xf32> to vector<2x16x128xf32>
    %c0_114 = arith.constant 0 : index
    %c0_115 = arith.constant 0 : index
    %c0_116 = arith.constant 0 : index
    %319 = vector.load %arg4[%c0_114, %c0_115, %c0_116] : memref<2x16x128xf32, #tpu.memory_space<vmem>>, vector<2x16x128xf32>
    tpu.vector_store %arg4[%c0_114, %c0_115, %c0_116], %318 {strides = array<i32>} : memref<2x16x128xf32, #tpu.memory_space<vmem>>, vector<2x16x128xf32>,
    return
  }
  func.func @transform_0(%arg0: i32) -> (i32, i32, i32) {
    %c0_i32 = arith.constant 0 : i32
    %c0_i32_0 = arith.constant 0 : i32
    %c0_i32_1 = arith.constant 0 : i32
    return %arg0, %c0_i32, %c0_i32_0 : i32, i32, i32
  }
  func.func @transform_1(%arg0: i32) -> (i32, i32, i32) {
    %c0_i32 = arith.constant 0 : i32
    %c0_i32_0 = arith.constant 0 : i32
    %c0_i32_1 = arith.constant 0 : i32
    %c0_i32_2 = arith.constant 0 : i32
    return %c0_i32, %c0_i32_0, %c0_i32_1 : i32, i32, i32
  }
  func.func @transform_2(%arg0: i32) -> (i32, i32, i32) {
    %c0_i32 = arith.constant 0 : i32
    %c0_i32_0 = arith.constant 0 : i32
    %c0_i32_1 = arith.constant 0 : i32
    %c0_i32_2 = arith.constant 0 : i32
    return %c0_i32, %c0_i32_0, %c0_i32_1 : i32, i32, i32
  }
  func.func @transform_3(%arg0: i32) -> (i32, i32, i32) {
    %c0_i32 = arith.constant 0 : i32
    %c0_i32_0 = arith.constant 0 : i32
    %c0_i32_1 = arith.constant 0 : i32
    return %arg0, %c0_i32, %c0_i32_0 : i32, i32, i32
  }
}

</mosaic_0001>

<bundles_post_ra>
// kernel: hmap_resblock_forward.1
= control target key start
LH: loop header
LB: loop body
LE: loop exit
PB: predicated region body
PF: predicated region fallthrough
CT: control target
= control target key end

     0   :  { %v4521_v3 = vmov 0   ;;  %s4522_s6 = smov 120   ;;  %s4523_s11 = smov 8   ;;  %v15_v54 = vlaneseq  ;;  %s5917_s0 = inlined_call_operand.vmem [shape: f32[2,16,128], index: 0, kind: input, shape index: {}]   ;;  %s5918_s1 = inlined_call_operand.vmem [shape: bf16[9,128,256], index: 1, kind: input, shape index: {}]   ;;  %s5919_s2 = inlined_call_operand.vmem [shape: bf16[9,128,128], index: 2, kind: input, shape index: {}]   ;;  %s5920_s3 = inlined_call_operand.vmem [shape: f32[2,16,128], index: 3, kind: output, shape index: {}]  }
   0x1   :  { %v4550_v0 = vld [vmem:[%s5917_s0] sm:$0xff]  ;;  %v4555_v1 = vld [vmem:[%s5917_s0 + $0x8] sm:$0xff]  ;;  %v4560_v2 = vld [vmem:[%s5917_s0 + $0x10] sm:$0xff]  ;;  %220 = vmatprep.mubr.bf16.mxu0 %v4521_v3  ;;  %s4525_s22 = smov 96   ;;  %s4526_s23 = smov 64  }
   0x2   :  { %23 = vst [vmem:[#allocation2 + $0x1] sm:$0xff] %v4550_v0  ;;  %24 = vst [vmem:[#allocation2 + $0x9] sm:$0xff] %v4555_v1  ;;  %v4570_v4 = vld [vmem:[%s5917_s0 + $0x18] sm:$0xff]  ;;  %v4205_v5 = vld [vmem:[%s5918_s1 + $0x84] ss:$8 sps:$4 sm:$0xff]   ;;  %v4110_v20 = vpack.i.bf16 %v4555_v1, %v4550_v0  ;;  %v4708_v56 = vand.u32 127, %v15_v54 }
   0x3   :  { %27 = vst [vmem:[#allocation2 - $0x1] sm:$0x2] %v4550_v0  ;;  %29 = vst [vmem:[#allocation2 + $0xb] sm:$0x40] %v4555_v1  ;;  %v4207_v6 = vld [vmem:[%s5918_s1 + $0x80] ss:$8 sps:$4 sm:$0xff]   ;;  %188 = vmatprep.subr.bf16.mxu0 %v4205_v5  ;;  %v4120_v23 = vpack.i.bf16 %v4570_v4, %v4560_v2 }
   0x4   :  { %25 = vst [vmem:[#allocation2 + $0x19] sm:$0xff] %v4560_v2  ;;  %28 = vst [vmem:[#allocation2 + $0x17] sm:$0x2] %v4560_v2  ;;  %v4208_v7 = vld [vmem:[%s5918_s1 + $0x94] ss:$8 sps:$4 sm:$0xff]   ;;  %189 = vmatpush1.bf16.msra.mxu0 %v4207_v6  ;;  %vm17_vm0 = vcmp.lt.s32.totalorder %v4708_v56, 8 }
   0x5   :  { %26 = vst [vmem:[#allocation2 + $0x21] sm:$0xff] %v4570_v4  ;;  %30 = vst [vmem:[#allocation2 + $0x23] sm:$0x40] %v4570_v4  ;;  %v4210_v8 = vld [vmem:[%s5918_s1 + $0x90] ss:$8 sps:$4 sm:$0xff]   ;;  %190 = vmatprep.subr.bf16.mxu0 %v4208_v7  ;;  %vm18_vm1 = vcmp.ge.s32.totalorder %v4708_v56, 120 }
   0x6   :  { %v4211_v9 = vld [vmem:[%s5918_s1 + $0xa4] ss:$8 sps:$4 sm:$0xff]   ;;  %v4213_v10 = vld [vmem:[%s5918_s1 + $0xa0] ss:$8 sps:$4 sm:$0xff]   ;;  %v4214_v17 = vld [vmem:[%s5918_s1 + $0xb4] ss:$8 sps:$4 sm:$0xff]  }
   0x7   :  { %v4216_v18 = vld [vmem:[%s5918_s1 + $0xb0] ss:$8 sps:$4 sm:$0xff]   ;;  %v4217_v19 = vld [vmem:[%s5918_s1 + $0xc4] ss:$8 sps:$4 sm:$0xff]   ;;  %v4219_v21 = vld [vmem:[%s5918_s1 + $0xc0] ss:$8 sps:$4 sm:$0xff]  }
   0x8   :  { %191 = vmatpush1.bf16.msra.mxu0 %v4210_v8  ;;  %v4220_v22 = vld [vmem:[%s5918_s1 + $0xd4] ss:$8 sps:$4 sm:$0xff]   ;;  %v4222_v24 = vld [vmem:[%s5918_s1 + $0xd0] ss:$8 sps:$4 sm:$0xff]   ;;  %v4223_v25 = vld [vmem:[%s5918_s1 + $0xe4] ss:$8 sps:$4 sm:$0xff]  }
   0x9   :  { %v32_v12 = vld [vmem:[#allocation2 + $0x8] sm:$0xff]  ;;  %192 = vmatprep.subr.bf16.mxu0 %v4211_v9  ;;  %v4226_v27 = vld [vmem:[%s5918_s1 + $0xf4] ss:$8 sps:$4 sm:$0xff]   ;;  %v4228_v28 = vld [vmem:[%s5918_s1 + $0xf0] ss:$8 sps:$4 sm:$0xff]  }
   0xa   :  { %v31_v11 = vld [vmem:[#allocation2] sm:$0xff]  ;;  %v4234_v32 = vld [vmem:[%s5918_s1 + $0x14] ss:$8 sps:$4 sm:$0xff]   ;;  %v4232_v33 = vld [vmem:[%s5918_s1 + $0x10] ss:$8 sps:$4 sm:$0xff]  }
   0xb   :  { %v33_v13 = vld [vmem:[#allocation2 + $0x18] sm:$0xff]  ;;  %v4085_v14 = vpack.i.bf16 %v32_v12, %v31_v11  ;;  %v4225_v26 = vld [vmem:[%s5918_s1 + $0xe0] ss:$8 sps:$4 sm:$0xff]   ;;  %v4231_v29 = vld [vmem:[%s5918_s1 + $0x4] ss:$8 sps:$4 sm:$0xff]   ;;  %v89_v30 = vpack.c.bf16 %v32_v12, %v31_v11 }
   0xc   :  { %v34_v15 = vld [vmem:[#allocation2 + $0x20] sm:$0xff]  ;;  %193 = vmatpush1.bf16.msra.mxu0 %v4213_v10  ;;  %v4240_v36 = vld [vmem:[%s5918_s1 + $0x34] ss:$8 sps:$4 sm:$0xff]   ;;  %v4238_v38 = vld [vmem:[%s5918_s1 + $0x30] ss:$8 sps:$4 sm:$0xff]  }
   0xd   :  { %v4095_v16 = vpack.i.bf16 %v34_v15, %v33_v13  ;;  %4086 = vrot.lane.b32.xlu0 %v4085_v14, %s4522_s6  ;;  %194 = vmatprep.subr.bf16.mxu0 %v4214_v17  ;;  %v4229_v31 = vld [vmem:[%s5918_s1] ss:$8 sps:$4 sm:$0xff]   ;;  %v4237_v34 = vld [vmem:[%s5918_s1 + $0x24] ss:$8 sps:$4 sm:$0xff]   ;;  %v90_v37 = vpack.c.bf16 %v34_v15, %v33_v13  ;;  %v4246_v44 = vld [vmem:[%s5918_s1 + $0x54] ss:$8 sps:$4 sm:$0xff]  }
   0xe   :  { %v4235_v35 = vld [vmem:[%s5918_s1 + $0x20] ss:$8 sps:$4 sm:$0xff]   ;;  %v4243_v41 = vld [vmem:[%s5918_s1 + $0x44] ss:$8 sps:$4 sm:$0xff]   ;;  %v4244_v45 = vld [vmem:[%s5918_s1 + $0x50] ss:$8 sps:$4 sm:$0xff]  }
   0xf   :  { %4096 = vrot.lane.b32.xlu1 %v4095_v16, %s4522_s6  ;;  %v4662_v39 = vld [vmem:[#allocation2 + $0x2] sm:$0xff]  ;;  %v4664_v40 = vld [vmem:[#allocation2 + $0xa] sm:$0xff]  ;;  %v4252_v48 = vld [vmem:[%s5918_s1 + $0x74] ss:$8 sps:$4 sm:$0xff]  }
  0x10   :  { %195 = vmatpush1.bf16.msra.mxu0 %v4216_v18  ;;  %v4130_v42 = vpack.i.bf16 %v4664_v40, %v4662_v39  ;;  %v4241_v43 = vld [vmem:[%s5918_s1 + $0x40] ss:$8 sps:$4 sm:$0xff]   ;;  %v4249_v46 = vld [vmem:[%s5918_s1 + $0x64] ss:$8 sps:$4 sm:$0xff]   ;;  %v4250_v49 = vld [vmem:[%s5918_s1 + $0x70] ss:$8 sps:$4 sm:$0xff]  }
  0x11   :  { %4091 = vrot.lane.b32.xlu0 %v4085_v14, %s4523_s11  ;;  %196 = vmatprep.subr.bf16.mxu0 %v4217_v19  ;;  %v4247_v47 = vld [vmem:[%s5918_s1 + $0x60] ss:$8 sps:$4 sm:$0xff]   ;;  %v4255_v50 = vld [vmem:[%s5918_s1 + $0x104] ss:$8 sps:$4 sm:$0xff]   ;;  %v4258_v13 = vld [vmem:[%s5918_s1 + $0x114] ss:$8 sps:$4 sm:$0xff]  }
  0x12   :  { %v4697_v51 = vld [vmem:[#allocation2 + $0x1a] sm:$0xff]  ;;  %v4699_v52 = vld [vmem:[#allocation2 + $0x22] sm:$0xff] }
  0x13   :  { %4101 = vrot.lane.b32.xlu1 %v4095_v16, %s4523_s11  ;;  %v4140_v53 = vpack.i.bf16 %v4699_v52, %v4697_v51  ;;  %v4253_v9 = vld [vmem:[%s5918_s1 + $0x100] ss:$8 sps:$4 sm:$0xff]   ;;  %v4480_v56 = vld [vmem:[%s5919_s2 + $0x1d8] sm:$0xff]  }
  0x14   :  { %197 = vmatpush1.bf16.msra.mxu0 %v4219_v21 }
  0x15   :  { %4106 = vrot.lane.b32.xlu0 %v4110_v20, %s4522_s6  ;;  %198 = vmatprep.subr.bf16.mxu0 %v4220_v22 }
  0x17   :  { %4111 = vrot.lane.b32.xlu1 %v4110_v20, %s4523_s11  ;;  %v4256_v20 = vld [vmem:[%s5918_s1 + $0x110] ss:$8 sps:$4 sm:$0xff]  }
  0x18   :  { %199 = vmatpush1.bf16.msra.mxu0 %v4222_v24 }
  0x19   :  { %4116 = vrot.lane.b32.xlu0 %v4120_v23, %s4522_s6  ;;  %200 = vmatprep.subr.bf16.mxu0 %v4223_v25 }
  0x1b   :  { %4121 = vrot.lane.b32.xlu1 %v4120_v23, %s4523_s11  ;;  %v4261_v23 = vld [vmem:[%s5918_s1 + $0x124] ss:$8 sps:$4 sm:$0xff]  }
  0x1c   :  { %201 = vmatpush1.bf16.msra.mxu0 %v4225_v26 }
  0x1d   :  { %202 = vmatprep.subr.bf16.mxu0 %v4226_v27  ;;  %4126 = vrot.lane.b32.xlu0 %v4130_v42, %s4522_s6 }
  0x1f   :  { %4131 = vrot.lane.b32.xlu1 %v4130_v42, %s4523_s11  ;;  %v4267_v42 = vld [vmem:[%s5918_s1 + $0x144] ss:$8 sps:$4 sm:$0xff]  }
  0x20   :  { %203 = vmatpush1.bf16.msra.mxu0 %v4228_v28 }
  0x21   :  { %321 = vmatprep.subr.bf16.mxu0 %v4231_v29  ;;  %4136 = vrot.lane.b32.xlu0 %v4140_v53, %s4522_s6 }
  0x23   :  { %221 = vmatmul.mubr.bf16.vlgmr.msra.gmra.mrb[0].mxu0 %v89_v30  ;;  %4141 = vrot.lane.b32.xlu1 %v4140_v53, %s4523_s11 }
  0x24   :  { %322 = vmatpush1.bf16.msra.mxu0 %v4229_v31  ;;  %230 = vmatprep.mubr.bf16.mxu0 %v4521_v3 }
  0x25   :  { %323 = vmatprep.subr.bf16.mxu0 %v4234_v32 }
  0x28   :  { %324 = vmatpush1.bf16.msra.mxu0 %v4232_v33 }
  0x29   :  { %325 = vmatprep.subr.bf16.mxu0 %v4237_v34  ;;  %v4259_v34 = vld [vmem:[%s5918_s1 + $0x120] ss:$8 sps:$4 sm:$0xff]  }
  0x2b   :  { %231 = vmatmul.mubr.bf16.gmra.mrb[4].mxu0 %v90_v37 }
  0x2c   :  { %326 = vmatpush1.bf16.msra.mxu0 %v4235_v35  ;;  %353 = vmatprep.mubr.bf16.mxu0 %v4521_v3  ;;  %v4264_v35 = vld [vmem:[%s5918_s1 + $0x134] ss:$8 sps:$4 sm:$0xff]  }
  0x2d   :  { %327 = vmatprep.subr.bf16.mxu0 %v4240_v36 }
  0x30   :  { %328 = vmatpush1.bf16.msra.mxu0 %v4238_v38 }
  0x31   :  { %329 = vmatprep.subr.bf16.mxu0 %v4243_v41  ;;  %v4262_v41 = vld [vmem:[%s5918_s1 + $0x130] ss:$8 sps:$4 sm:$0xff]  }
  0x34   :  { %330 = vmatpush1.bf16.msra.mxu0 %v4241_v43  ;;  %v4265_v43 = vld [vmem:[%s5918_s1 + $0x140] ss:$8 sps:$4 sm:$0xff]  }
  0x35   :  { %331 = vmatprep.subr.bf16.mxu0 %v4246_v44  ;;  %v4270_v44 = vld [vmem:[%s5918_s1 + $0x154] ss:$8 sps:$4 sm:$0xff]  }
  0x38   :  { %332 = vmatpush1.bf16.msra.mxu0 %v4244_v45  ;;  %v4268_v45 = vld [vmem:[%s5918_s1 + $0x150] ss:$8 sps:$4 sm:$0xff]  }
  0x39   :  { %333 = vmatprep.subr.bf16.mxu0 %v4249_v46  ;;  %v4273_v46 = vld [vmem:[%s5918_s1 + $0x164] ss:$8 sps:$4 sm:$0xff]  }
  0x3c   :  { %334 = vmatpush1.bf16.msra.mxu0 %v4247_v47  ;;  %v4271_v47 = vld [vmem:[%s5918_s1 + $0x160] ss:$8 sps:$4 sm:$0xff]  }
  0x3d   :  { %335 = vmatprep.subr.bf16.mxu0 %v4252_v48  ;;  %v4276_v48 = vld [vmem:[%s5918_s1 + $0x174] ss:$8 sps:$4 sm:$0xff]  }
  0x40   :  { %336 = vmatpush1.bf16.msra.mxu0 %v4250_v49  ;;  %v4274_v49 = vld [vmem:[%s5918_s1 + $0x170] ss:$8 sps:$4 sm:$0xff]  }
  0x41   :  { %473 = vmatprep.subr.bf16.mxu0 %v4255_v50  ;;  %v4279_v50 = vld [vmem:[%s5918_s1 + $0x184] ss:$8 sps:$4 sm:$0xff]  }
  0x7f   :  { %v4705_v55 = vpop.permute.xlu0 %4086 }
  0x80   :  { %v4089_v59 = vunpack.i.h.bf16 %v4705_v55  ;;  %v4088_v60 = vunpack.i.l.bf16 %v4705_v55  ;;  %v4277_v55 = vld [vmem:[%s5918_s1 + $0x180] ss:$8 sps:$4 sm:$0xff]  }
  0x81   :  { %v4710_v57 = vpop.permute.xlu1 %4096 }
  0x82   :  { %v4099_v5 = vunpack.i.h.bf16 %v4710_v57  ;;  %v4098_v6 = vunpack.i.l.bf16 %v4710_v57  ;;  %v4286_v57 = vld [vmem:[%s5918_s1 + $0x1b0] ss:$8 sps:$4 sm:$0xff]  }
  0x83   :  { %v4713_v58 = vpop.permute.xlu0 %4091 }
  0x84   :  { %v4094_v61 = vunpack.i.h.bf16 %v4713_v58  ;;  %v4093_v62 = vunpack.i.l.bf16 %v4713_v58 }
  0x85   :  { %v4719_v63 = vpop.permute.xlu1 %4101 }
  0x86   :  { %v63_v7 = vsel %vm17_vm0, %v4088_v60, %v4093_v62  ;;  %v64_v8 = vsel %vm17_vm0, %v4089_v59, %v4094_v61  ;;  %v4104_v10 = vunpack.i.h.bf16 %v4719_v63  ;;  %v4103_v11 = vunpack.i.l.bf16 %v4719_v63  ;;  %v4291_v63 = vld [vmem:[%s5918_s1 + $0x1c4] ss:$8 sps:$4 sm:$0xff]  }
  0x87   :  { %v71_v12 = vpack.c.bf16 %v64_v8, %v63_v7  ;;  %v4743_v14 = vpop.permute.xlu0 %4106  ;;  %v67_v53 = vsel %vm18_vm1, %v4093_v62, %v4088_v60  ;;  %v68_v7 = vsel %vm18_vm1, %v4094_v61, %v4089_v59  ;;  %v4282_v59 = vld [vmem:[%s5918_s1 + $0x194] ss:$8 sps:$4 sm:$0xff]  }
  0x88   :  { %v4109_v16 = vunpack.i.h.bf16 %v4743_v14  ;;  %v4108_v19 = vunpack.i.l.bf16 %v4743_v14  ;;  %v65_v21 = vsel %vm17_vm0, %v4098_v6, %v4103_v11  ;;  %v66_v22 = vsel %vm17_vm0, %v4099_v5, %v4104_v10  ;;  %v4306_v14 = vld [vmem:[%s5918_s1 + $0x214] ss:$8 sps:$4 sm:$0xff]  }
  0x89   :  { %v4745_v15 = vpop.permute.xlu1 %4111  ;;  %354 = vmatmul.mubr.bf16.vlgmr.msra.gmra.mrb[0].mxu0 %v71_v12  ;;  %v72_v31 = vpack.c.bf16 %v66_v22, %v65_v21  ;;  %v374_v58 = vpack.c.bf16 %v68_v7, %v67_v53  ;;  %v4280_v22 = vld [vmem:[%s5918_s1 + $0x190] ss:$8 sps:$4 sm:$0xff]  }
  0x8a   :  { %v4114_v17 = vunpack.i.h.bf16 %v4745_v15  ;;  %v4113_v18 = vunpack.i.l.bf16 %v4745_v15  ;;  %474 = vmatpush1.bf16.msra.mxu0 %v4253_v9  ;;  %363 = vmatprep.mubr.bf16.mxu0 %v4521_v3  ;;  %v4301_v15 = vld [vmem:[%s5918_s1 + $0x200] ss:$8 sps:$4 sm:$0xff]  }
  0x8b   :  { %475 = vmatprep.subr.bf16.mxu0 %v4258_v13  ;;  %v4787_v26 = vpop.permute.xlu0 %4116 }
  0x8c   :  { %v4777_v24 = vsel %vm18_vm1, %v4114_v17, %v4109_v16  ;;  %v4785_v25 = vsel %vm18_vm1, %v4113_v18, %v4108_v19  ;;  %v4119_v29 = vunpack.i.h.bf16 %v4787_v26  ;;  %v4118_v30 = vunpack.i.l.bf16 %v4787_v26  ;;  %v4310_v26 = vld [vmem:[%s5918_s1 + $0x230] ss:$8 sps:$4 sm:$0xff]  }
  0x8d   :  { %v894_v27 = vpack.c.bf16 %v4777_v24, %v4785_v25  ;;  %v4791_v28 = vpop.permute.xlu1 %4121  ;;  %v4360_v24 = vld [vmem:[%s5918_s1 + $0x334] ss:$8 sps:$4 sm:$0xff]   ;;  %v4358_v25 = vld [vmem:[%s5918_s1 + $0x330] ss:$8 sps:$4 sm:$0xff]  }
  0x8e   :  { %v4124_v32 = vunpack.i.h.bf16 %v4791_v28  ;;  %v4123_v33 = vunpack.i.l.bf16 %v4791_v28  ;;  %476 = vmatpush1.bf16.msra.mxu0 %v4256_v20  ;;  %v4312_v28 = vld [vmem:[%s5918_s1 + $0x234] ss:$8 sps:$4 sm:$0xff]  }
  0x8f   :  { %477 = vmatprep.subr.bf16.mxu0 %v4261_v23  ;;  %v4866_v9 = vpop.permute.xlu0 %4126  ;;  %v4285_v23 = vld [vmem:[%s5918_s1 + $0x1a4] ss:$8 sps:$4 sm:$0xff]  }
  0x90   :  { %v4809_v36 = vsel %vm18_vm1, %v4123_v33, %v4118_v30  ;;  %v4817_v37 = vsel %vm18_vm1, %v4124_v32, %v4119_v29  ;;  %v4129_v20 = vunpack.i.h.bf16 %v4866_v9  ;;  %v4128_v21 = vunpack.i.l.bf16 %v4866_v9  ;;  %v4378_v9 = vld [vmem:[%s5918_s1 + $0x394] ss:$8 sps:$4 sm:$0xff]  }
  0x91   :  { %v895_v38 = vpack.c.bf16 %v4817_v37, %v4809_v36  ;;  %364 = vmatmul.mubr.bf16.gmra.mrb[4].mxu0 %v72_v31  ;;  %v4864_v8 = vpop.permute.xlu1 %4131  ;;  %v69_v31 = vsel %vm18_vm1, %v4103_v11, %v4098_v6  ;;  %v4294_v6 = vld [vmem:[%s5918_s1 + $0x1d4] ss:$8 sps:$4 sm:$0xff]   ;;  %v4297_v11 = vld [vmem:[%s5918_s1 + $0x1e4] ss:$8 sps:$4 sm:$0xff]   ;;  %v4364_v37 = vld [vmem:[%s5918_s1 + $0x350] ss:$8 sps:$4 sm:$0xff]  }
  0x92   :  { %478 = vmatpush1.bf16.msra.mxu0 %v4259_v34  ;;  %505 = vmatprep.mubr.bf16.mxu0 %v4521_v3  ;;  %v4134_v12 = vunpack.i.h.bf16 %v4864_v8  ;;  %v4133_v13 = vunpack.i.l.bf16 %v4864_v8  ;;  %v70_v34 = vsel %vm18_vm1, %v4104_v10, %v4099_v5  ;;  %v4289_v5 = vld [vmem:[%s5918_s1 + $0x1c0] ss:$8 sps:$4 sm:$0xff]   ;;  %v4292_v10 = vld [vmem:[%s5918_s1 + $0x1d0] ss:$8 sps:$4 sm:$0xff]   ;;  %v4366_v36 = vld [vmem:[%s5918_s1 + $0x354] ss:$8 sps:$4 sm:$0xff]  }
  0x93   :  { %479 = vmatprep.subr.bf16.mxu0 %v4264_v35  ;;  %v4283_v35 = vld [vmem:[%s5918_s1 + $0x1a0] ss:$8 sps:$4 sm:$0xff]  }
  0x94   :  { %v4884_v60 = vsel %vm18_vm1, %v4134_v12, %v4129_v20  ;;  %v4892_v61 = vsel %vm18_vm1, %v4133_v13, %v4128_v21  ;;  %v4373_v8 = vld [vmem:[%s5918_s1 + $0x380] ss:$8 sps:$4 sm:$0xff]  }
  0x95   :  { %v1414_v62 = vpack.c.bf16 %v4884_v60, %v4892_v61 }
  0x96   :  { %480 = vmatpush1.bf16.msra.mxu0 %v4262_v41  ;;  %v375_v41 = vpack.c.bf16 %v70_v34, %v69_v31 }
  0x97   :  { %481 = vmatprep.subr.bf16.mxu0 %v4267_v42  ;;  %v4288_v42 = vld [vmem:[%s5918_s1 + $0x1b4] ss:$8 sps:$4 sm:$0xff]  }
  0x9a   :  { %482 = vmatpush1.bf16.msra.mxu0 %v4265_v43  ;;  %v4940_v43 = vpop.permute.xlu1 %4141 }
  0x9b   :  { %483 = vmatprep.subr.bf16.mxu0 %v4270_v44  ;;  %v4942_v44 = vpop.permute.xlu0 %4136 }
  0x9e   :  { %484 = vmatpush1.bf16.msra.mxu0 %v4268_v45  ;;  %v4144_v45 = vunpack.i.h.bf16 %v4940_v43 }
  0x9f   :  { %485 = vmatprep.subr.bf16.mxu0 %v4273_v46  ;;  %v4143_v46 = vunpack.i.l.bf16 %v4940_v43  ;;  %v4384_v43 = vld [vmem:[%s5918_s1 + $0x3b4] ss:$8 sps:$4 sm:$0xff]  }
  0xa2   :  { %486 = vmatpush1.bf16.msra.mxu0 %v4271_v47  ;;  %v4139_v47 = vunpack.i.h.bf16 %v4942_v44 }
  0xa3   :  { %487 = vmatprep.subr.bf16.mxu0 %v4276_v48  ;;  %v4138_v48 = vunpack.i.l.bf16 %v4942_v44  ;;  %v4382_v44 = vld [vmem:[%s5918_s1 + $0x3b0] ss:$8 sps:$4 sm:$0xff]  }
  0xa4   :  { %v4968_v7 = vsel %vm18_vm1, %v4144_v45, %v4139_v47 }
  0xa5   :  { %v4960_v53 = vsel %vm18_vm1, %v4143_v46, %v4138_v48 }
  0xa6   :  { %488 = vmatpush1.bf16.msra.mxu0 %v4274_v49  ;;  %v4295_v49 = vld [vmem:[%s5918_s1 + $0x1e0] ss:$8 sps:$4 sm:$0xff]  }
  0xa7   :  { %673 = vmatprep.subr.bf16.mxu0 %v4279_v50  ;;  %v4300_v50 = vld [vmem:[%s5918_s1 + $0x1f4] ss:$8 sps:$4 sm:$0xff]  }
  0xa9   :  { %506 = vmatmul.mubr.bf16.vlgmr.msra.gmra.mrb[0].mxu0 %v374_v58  ;;  %v567_v58 = vsel %vm17_vm0, %v4109_v16, %v4114_v17  ;;  %v4304_v16 = vld [vmem:[%s5918_s1 + $0x210] ss:$8 sps:$4 sm:$0xff]   ;;  %v568_v17 = vsel %vm17_vm0, %v4118_v30, %v4123_v33  ;;  %v4313_v30 = vld [vmem:[%s5918_s1 + $0x240] ss:$8 sps:$4 sm:$0xff]  }
  0xaa   :  { %674 = vmatpush1.bf16.msra.mxu0 %v4277_v55  ;;  %515 = vmatprep.mubr.bf16.mxu0 %v4521_v3  ;;  %v1415_v55 = vpack.c.bf16 %v4968_v7, %v4960_v53  ;;  %v4316_v33 = vld [vmem:[%s5918_s1 + $0x250] ss:$8 sps:$4 sm:$0xff]  }
  0xab   :  { %675 = vmatprep.subr.bf16.mxu0 %v4282_v59  ;;  %v566_v59 = vsel %vm17_vm0, %v4108_v19, %v4113_v18  ;;  %v569_v18 = vsel %vm17_vm0, %v4119_v29, %v4124_v32  ;;  %v4309_v19 = vld [vmem:[%s5918_s1 + $0x224] ss:$8 sps:$4 sm:$0xff]   ;;  %v4318_v32 = vld [vmem:[%s5918_s1 + $0x254] ss:$8 sps:$4 sm:$0xff]  }
  0xac   :  { %v574_v31 = vpack.c.bf16 %v567_v58, %v566_v59  ;;  %v575_v34 = vpack.c.bf16 %v569_v18, %v568_v17  ;;  %v4315_v29 = vld [vmem:[%s5918_s1 + $0x244] ss:$8 sps:$4 sm:$0xff]   ;;  %v735_v58 = vpack.c.bf16 %v4570_v4, %v4560_v2  ;;  %v4331_v59 = vld [vmem:[%s5918_s1 + $0x2a0] ss:$8 sps:$4 sm:$0xff]  }
  0xad   :  { %v4345_v17 = vld [vmem:[%s5918_s1 + $0x2e4] ss:$8 sps:$4 sm:$0xff]   ;;  %v4343_v18 = vld [vmem:[%s5918_s1 + $0x2e0] ss:$8 sps:$4 sm:$0xff]  }
  0xae   :  { %676 = vmatpush1.bf16.msra.mxu0 %v4280_v22  ;;  %v4298_v22 = vld [vmem:[%s5918_s1 + $0x1f0] ss:$8 sps:$4 sm:$0xff]  }
  0xaf   :  { %677 = vmatprep.subr.bf16.mxu0 %v4285_v23  ;;  %v4303_v23 = vld [vmem:[%s5918_s1 + $0x204] ss:$8 sps:$4 sm:$0xff]  }
  0xb1   :  { %516 = vmatmul.mubr.bf16.gmra.mrb[4].mxu0 %v375_v41  ;;  %v4321_v41 = vld [vmem:[%s5918_s1 + $0x264] ss:$8 sps:$4 sm:$0xff]  }
  0xb2   :  { %678 = vmatpush1.bf16.msra.mxu0 %v4283_v35  ;;  %705 = vmatprep.mubr.bf16.mxu0 %v4521_v3  ;;  %v4307_v35 = vld [vmem:[%s5918_s1 + $0x220] ss:$8 sps:$4 sm:$0xff]  }
  0xb3   :  { %679 = vmatprep.subr.bf16.mxu0 %v4288_v42  ;;  %v4319_v42 = vld [vmem:[%s5918_s1 + $0x260] ss:$8 sps:$4 sm:$0xff]  }
  0xb6   :  { %680 = vmatpush1.bf16.msra.mxu0 %v4286_v57  ;;  %v4324_v57 = vld [vmem:[%s5918_s1 + $0x274] ss:$8 sps:$4 sm:$0xff]  }
  0xb7   :  { %681 = vmatprep.subr.bf16.mxu0 %v4291_v63  ;;  %v4322_v63 = vld [vmem:[%s5918_s1 + $0x270] ss:$8 sps:$4 sm:$0xff]  }
  0xba   :  { %682 = vmatpush1.bf16.msra.mxu0 %v4289_v5  ;;  %v4327_v5 = vld [vmem:[%s5918_s1 + $0x284] ss:$8 sps:$4 sm:$0xff]  }
  0xbb   :  { %683 = vmatprep.subr.bf16.mxu0 %v4294_v6  ;;  %v734_v6 = vpack.c.bf16 %v4555_v1, %v4550_v0 }
  0xbe   :  { %684 = vmatpush1.bf16.msra.mxu0 %v4292_v10  ;;  %v4325_v10 = vld [vmem:[%s5918_s1 + $0x280] ss:$8 sps:$4 sm:$0xff]  }
  0xbf   :  { %685 = vmatprep.subr.bf16.mxu0 %v4297_v11  ;;  %v4330_v11 = vld [vmem:[%s5918_s1 + $0x294] ss:$8 sps:$4 sm:$0xff]  }
  0xc2   :  { %686 = vmatpush1.bf16.msra.mxu0 %v4295_v49  ;;  %v4328_v49 = vld [vmem:[%s5918_s1 + $0x290] ss:$8 sps:$4 sm:$0xff]  }
  0xc3   :  { %687 = vmatprep.subr.bf16.mxu0 %v4300_v50  ;;  %v4333_v50 = vld [vmem:[%s5918_s1 + $0x2a4] ss:$8 sps:$4 sm:$0xff]  }
  0xc6   :  { %688 = vmatpush1.bf16.msra.mxu0 %v4298_v22  ;;  %v4336_v22 = vld [vmem:[%s5918_s1 + $0x2b4] ss:$8 sps:$4 sm:$0xff]  }
  0xc7   :  { %833 = vmatprep.subr.bf16.mxu0 %v4303_v23  ;;  %v4334_v23 = vld [vmem:[%s5918_s1 + $0x2b0] ss:$8 sps:$4 sm:$0xff]  }
  0xc9   :  { %706 = vmatmul.mubr.bf16.vlgmr.msra.gmra.mrb[0].mxu0 %v574_v31  ;;  %v4339_v31 = vld [vmem:[%s5918_s1 + $0x2c4] ss:$8 sps:$4 sm:$0xff]  }
  0xca   :  { %834 = vmatpush1.bf16.msra.mxu0 %v4301_v15  ;;  %715 = vmatprep.mubr.bf16.mxu0 %v4521_v3  ;;  %v4337_v15 = vld [vmem:[%s5918_s1 + $0x2c0] ss:$8 sps:$4 sm:$0xff]  }
  0xcb   :  { %835 = vmatprep.subr.bf16.mxu0 %v4306_v14  ;;  %v4342_v14 = vld [vmem:[%s5918_s1 + $0x2d4] ss:$8 sps:$4 sm:$0xff]  }
  0xce   :  { %836 = vmatpush1.bf16.msra.mxu0 %v4304_v16  ;;  %v4340_v16 = vld [vmem:[%s5918_s1 + $0x2d0] ss:$8 sps:$4 sm:$0xff]  }
  0xcf   :  { %837 = vmatprep.subr.bf16.mxu0 %v4309_v19  ;;  %v4348_v19 = vld [vmem:[%s5918_s1 + $0x2f4] ss:$8 sps:$4 sm:$0xff]  }
  0xd1   :  { %716 = vmatmul.mubr.bf16.gmra.mrb[4].mxu0 %v575_v34  ;;  %v4346_v34 = vld [vmem:[%s5918_s1 + $0x2f0] ss:$8 sps:$4 sm:$0xff]  }
  0xd2   :  { %838 = vmatpush1.bf16.msra.mxu0 %v4307_v35  ;;  %865 = vmatprep.mubr.bf16.mxu0 %v4521_v3  ;;  %v4351_v35 = vld [vmem:[%s5918_s1 + $0x304] ss:$8 sps:$4 sm:$0xff]  }
  0xd3   :  { %839 = vmatprep.subr.bf16.mxu0 %v4312_v28  ;;  %v4349_v28 = vld [vmem:[%s5918_s1 + $0x300] ss:$8 sps:$4 sm:$0xff]  }
  0xd6   :  { %840 = vmatpush1.bf16.msra.mxu0 %v4310_v26  ;;  %v4354_v26 = vld [vmem:[%s5918_s1 + $0x314] ss:$8 sps:$4 sm:$0xff]  }
  0xd7   :  { %841 = vmatprep.subr.bf16.mxu0 %v4315_v29  ;;  %v4352_v29 = vld [vmem:[%s5918_s1 + $0x310] ss:$8 sps:$4 sm:$0xff]  }
  0xda   :  { %842 = vmatpush1.bf16.msra.mxu0 %v4313_v30  ;;  %v4357_v30 = vld [vmem:[%s5918_s1 + $0x324] ss:$8 sps:$4 sm:$0xff]  }
  0xdb   :  { %843 = vmatprep.subr.bf16.mxu0 %v4318_v32  ;;  %v4355_v32 = vld [vmem:[%s5918_s1 + $0x320] ss:$8 sps:$4 sm:$0xff]  }
  0xde   :  { %844 = vmatpush1.bf16.msra.mxu0 %v4316_v33  ;;  %v4361_v33 = vld [vmem:[%s5918_s1 + $0x340] ss:$8 sps:$4 sm:$0xff]  }
  0xdf   :  { %845 = vmatprep.subr.bf16.mxu0 %v4321_v41  ;;  %v4367_v41 = vld [vmem:[%s5918_s1 + $0x360] ss:$8 sps:$4 sm:$0xff]  }
  0xe2   :  { %846 = vmatpush1.bf16.msra.mxu0 %v4319_v42  ;;  %v4372_v42 = vld [vmem:[%s5918_s1 + $0x374] ss:$8 sps:$4 sm:$0xff]  }
  0xe3   :  { %847 = vmatprep.subr.bf16.mxu0 %v4324_v57  ;;  %v1087_v57 = vsel %vm17_vm0, %v4129_v20, %v4134_v12  ;;  %v4376_v12 = vld [vmem:[%s5918_s1 + $0x390] ss:$8 sps:$4 sm:$0xff]   ;;  %v1089_v20 = vsel %vm17_vm0, %v4139_v47, %v4144_v45  ;;  %v4387_v45 = vld [vmem:[%s5918_s1 + $0x3c4] ss:$8 sps:$4 sm:$0xff]   ;;  %v4390_v47 = vld [vmem:[%s5918_s1 + $0x3d4] ss:$8 sps:$4 sm:$0xff]  }
  0xe6   :  { %848 = vmatpush1.bf16.msra.mxu0 %v4322_v63  ;;  %v1086_v63 = vsel %vm17_vm0, %v4128_v21, %v4133_v13  ;;  %v1088_v13 = vsel %vm17_vm0, %v4138_v48, %v4143_v46  ;;  %v4381_v21 = vld [vmem:[%s5918_s1 + $0x3a4] ss:$8 sps:$4 sm:$0xff]   ;;  %v4385_v46 = vld [vmem:[%s5918_s1 + $0x3c0] ss:$8 sps:$4 sm:$0xff]   ;;  %v4388_v48 = vld [vmem:[%s5918_s1 + $0x3d0] ss:$8 sps:$4 sm:$0xff]  }
  0xe7   :  { %993 = vmatprep.subr.bf16.mxu0 %v4327_v5  ;;  %v4370_v5 = vld [vmem:[%s5918_s1 + $0x370] ss:$8 sps:$4 sm:$0xff]  }
  0xe9   :  { %866 = vmatmul.mubr.bf16.vlgmr.msra.gmra.mrb[0].mxu0 %v734_v6  ;;  %v4375_v6 = vld [vmem:[%s5918_s1 + $0x384] ss:$8 sps:$4 sm:$0xff]  }
  0xea   :  { %994 = vmatpush1.bf16.msra.mxu0 %v4325_v10  ;;  %875 = vmatprep.mubr.bf16.mxu0 %v4521_v3  ;;  %v1094_v10 = vpack.c.bf16 %v1087_v57, %v1086_v63 }
  0xeb   :  { %995 = vmatprep.subr.bf16.mxu0 %v4330_v11  ;;  %v1095_v11 = vpack.c.bf16 %v1089_v20, %v1088_v13 }
  0xee   :  { %996 = vmatpush1.bf16.msra.mxu0 %v4328_v49  ;;  %v4379_v49 = vld [vmem:[%s5918_s1 + $0x3a0] ss:$8 sps:$4 sm:$0xff]  }
  0xef   :  { %997 = vmatprep.subr.bf16.mxu0 %v4333_v50  ;;  %v4393_v50 = vld [vmem:[%s5918_s1 + $0x3e4] ss:$8 sps:$4 sm:$0xff]  }
  0xf1   :  { %876 = vmatmul.mubr.bf16.gmra.mrb[4].mxu0 %v735_v58  ;;  %v4391_v58 = vld [vmem:[%s5918_s1 + $0x3e0] ss:$8 sps:$4 sm:$0xff]  }
  0xf2   :  { %998 = vmatpush1.bf16.msra.mxu0 %v4331_v59  ;;  %1025 = vmatprep.mubr.bf16.mxu0 %v4521_v3  ;;  %v4396_v59 = vld [vmem:[%s5918_s1 + $0x3f4] ss:$8 sps:$4 sm:$0xff]  }
  0xf3   :  { %999 = vmatprep.subr.bf16.mxu0 %v4336_v22  ;;  %v4394_v22 = vld [vmem:[%s5918_s1 + $0x3f0] ss:$8 sps:$4 sm:$0xff]  }
  0xf6   :  { %1000 = vmatpush1.bf16.msra.mxu0 %v4334_v23  ;;  %v4399_v23 = vld [vmem:[%s5918_s1 + $0x404] ss:$8 sps:$4 sm:$0xff]  }
  0xf7   :  { %1001 = vmatprep.subr.bf16.mxu0 %v4339_v31  ;;  %v1254_v31 = vpack.c.bf16 %v4664_v40, %v4662_v39  ;;  %v4405_v39 = vld [vmem:[%s5918_s1 + $0x424] ss:$8 sps:$4 sm:$0xff]   ;;  %v1255_v40 = vpack.c.bf16 %v4699_v52, %v4697_v51  ;;  %v4409_v52 = vld [vmem:[%s5918_s1 + $0x440] ss:$8 sps:$4 sm:$0xff]  }
  0xf8   :  { %v4411_v51 = vld [vmem:[%s5918_s1 + $0x444] ss:$8 sps:$4 sm:$0xff]  }
  0xfa   :  { %1002 = vmatpush1.bf16.msra.mxu0 %v4337_v15  ;;  %v4397_v15 = vld [vmem:[%s5918_s1 + $0x400] ss:$8 sps:$4 sm:$0xff]  }
  0xfb   :  { %1003 = vmatprep.subr.bf16.mxu0 %v4342_v14  ;;  %v4402_v14 = vld [vmem:[%s5918_s1 + $0x414] ss:$8 sps:$4 sm:$0xff]  }
  0xfe   :  { %1004 = vmatpush1.bf16.msra.mxu0 %v4340_v16  ;;  %v4400_v16 = vld [vmem:[%s5918_s1 + $0x410] ss:$8 sps:$4 sm:$0xff]  }
  0xff   :  { %1005 = vmatprep.subr.bf16.mxu0 %v4345_v17  ;;  %v4403_v17 = vld [vmem:[%s5918_s1 + $0x420] ss:$8 sps:$4 sm:$0xff]  }
 0x102   :  { %1006 = vmatpush1.bf16.msra.mxu0 %v4343_v18  ;;  %v4408_v18 = vld [vmem:[%s5918_s1 + $0x434] ss:$8 sps:$4 sm:$0xff]  }
 0x103   :  { %1007 = vmatprep.subr.bf16.mxu0 %v4348_v19  ;;  %v4406_v19 = vld [vmem:[%s5918_s1 + $0x430] ss:$8 sps:$4 sm:$0xff]  }
 0x106   :  { %1008 = vmatpush1.bf16.msra.mxu0 %v4346_v34  ;;  %v4414_v34 = vld [vmem:[%s5918_s1 + $0x454] ss:$8 sps:$4 sm:$0xff]  }
 0x107   :  { %1193 = vmatprep.subr.bf16.mxu0 %v4351_v35  ;;  %v4412_v35 = vld [vmem:[%s5918_s1 + $0x450] ss:$8 sps:$4 sm:$0xff]  }
 0x109   :  { %1026 = vmatmul.mubr.bf16.vlgmr.msra.gmra.mrb[0].mxu0 %v894_v27  ;;  %v4363_v27 = vld [vmem:[%s5918_s1 + $0x344] ss:$8 sps:$4 sm:$0xff]  }
 0x10a   :  { %1194 = vmatpush1.bf16.msra.mxu0 %v4349_v28  ;;  %1035 = vmatprep.mubr.bf16.mxu0 %v4521_v3  ;;  %v4417_v28 = vld [vmem:[%s5918_s1 + $0x464] ss:$8 sps:$4 sm:$0xff]  }
 0x10b   :  { %1195 = vmatprep.subr.bf16.mxu0 %v4354_v26  ;;  %v4415_v26 = vld [vmem:[%s5918_s1 + $0x460] ss:$8 sps:$4 sm:$0xff]  }
 0x10e   :  { %1196 = vmatpush1.bf16.msra.mxu0 %v4352_v29  ;;  %v4420_v29 = vld [vmem:[%s5918_s1 + $0x474] ss:$8 sps:$4 sm:$0xff]  }
 0x10f   :  { %1197 = vmatprep.subr.bf16.mxu0 %v4357_v30  ;;  %v4418_v30 = vld [vmem:[%s5918_s1 + $0x470] ss:$8 sps:$4 sm:$0xff]  }
 0x111   :  { %1036 = vmatmul.mubr.bf16.gmra.mrb[4].mxu0 %v895_v38  ;;  %v4369_v38 = vld [vmem:[%s5918_s1 + $0x364] ss:$8 sps:$4 sm:$0xff]   ;;  %s4524_s1 = smov 112  }
 0x112   :  { %1198 = vmatpush1.bf16.msra.mxu0 %v4355_v32  ;;  %1225 = vmatprep.mubr.bf16.mxu0 %v4521_v3 }
 0x113   :  { %1199 = vmatprep.subr.bf16.mxu0 %v4360_v24 }
 0x116   :  { %1200 = vmatpush1.bf16.msra.mxu0 %v4358_v25 }
 0x117   :  { %1201 = vmatprep.subr.bf16.mxu0 %v4363_v27 }
 0x11a   :  { %1202 = vmatpush1.bf16.msra.mxu0 %v4361_v33 }
 0x11b   :  { %1203 = vmatprep.subr.bf16.mxu0 %v4366_v36 }
 0x11e   :  { %1204 = vmatpush1.bf16.msra.mxu0 %v4364_v37 }
 0x11f   :  { %1205 = vmatprep.subr.bf16.mxu0 %v4369_v38 }
 0x122   :  { %1206 = vmatpush1.bf16.msra.mxu0 %v4367_v41 }
 0x123   :  { %1207 = vmatprep.subr.bf16.mxu0 %v4372_v42 }
 0x126   :  { %1208 = vmatpush1.bf16.msra.mxu0 %v4370_v5 }
 0x127   :  { %1353 = vmatprep.subr.bf16.mxu0 %v4375_v6 }
 0x129   :  { %1226 = vmatmul.mubr.bf16.vlgmr.msra.gmra.mrb[0].mxu0 %v1094_v10 }
 0x12a   :  { %1354 = vmatpush1.bf16.msra.mxu0 %v4373_v8  ;;  %1235 = vmatprep.mubr.bf16.mxu0 %v4521_v3 }
 0x12b   :  { %1355 = vmatprep.subr.bf16.mxu0 %v4378_v9 }
 0x12e   :  { %1356 = vmatpush1.bf16.msra.mxu0 %v4376_v12 }
 0x12f   :  { %1357 = vmatprep.subr.bf16.mxu0 %v4381_v21 }
 0x131   :  { %1236 = vmatmul.mubr.bf16.gmra.mrb[4].mxu0 %v1095_v11 }
 0x132   :  { %1358 = vmatpush1.bf16.msra.mxu0 %v4379_v49  ;;  %1385 = vmatprep.mubr.bf16.mxu0 %v4521_v3 }
 0x133   :  { %1359 = vmatprep.subr.bf16.mxu0 %v4384_v43 }
 0x136   :  { %1360 = vmatpush1.bf16.msra.mxu0 %v4382_v44 }
 0x137   :  { %1361 = vmatprep.subr.bf16.mxu0 %v4387_v45 }
 0x13a   :  { %1362 = vmatpush1.bf16.msra.mxu0 %v4385_v46 }
 0x13b   :  { %1363 = vmatprep.subr.bf16.mxu0 %v4390_v47 }
 0x13e   :  { %1364 = vmatpush1.bf16.msra.mxu0 %v4388_v48 }
 0x13f   :  { %1365 = vmatprep.subr.bf16.mxu0 %v4393_v50 }
 0x142   :  { %1366 = vmatpush1.bf16.msra.mxu0 %v4391_v58 }
 0x143   :  { %1367 = vmatprep.subr.bf16.mxu0 %v4396_v59 }
 0x146   :  { %1368 = vmatpush1.bf16.msra.mxu0 %v4394_v22 }
 0x147   :  { %1513 = vmatprep.subr.bf16.mxu0 %v4399_v23 }
 0x149   :  { %1386 = vmatmul.mubr.bf16.vlgmr.msra.gmra.mrb[0].mxu0 %v1254_v31 }
 0x14a   :  { %1514 = vmatpush1.bf16.msra.mxu0 %v4397_v15  ;;  %1395 = vmatprep.mubr.bf16.mxu0 %v4521_v3 }
 0x14b   :  { %1515 = vmatprep.subr.bf16.mxu0 %v4402_v14 }
 0x14e   :  { %1516 = vmatpush1.bf16.msra.mxu0 %v4400_v16 }
 0x14f   :  { %1517 = vmatprep.subr.bf16.mxu0 %v4405_v39 }
 0x151   :  { %1396 = vmatmul.mubr.bf16.gmra.mrb[4].mxu0 %v1255_v40 }
 0x152   :  { %1518 = vmatpush1.bf16.msra.mxu0 %v4403_v17  ;;  %1545 = vmatprep.mubr.bf16.mxu0 %v4521_v3 }
 0x153   :  { %1519 = vmatprep.subr.bf16.mxu0 %v4408_v18 }
 0x156   :  { %1520 = vmatpush1.bf16.msra.mxu0 %v4406_v19 }
 0x157   :  { %1521 = vmatprep.subr.bf16.mxu0 %v4411_v51 }
 0x15a   :  { %1522 = vmatpush1.bf16.msra.mxu0 %v4409_v52 }
 0x15b   :  { %1523 = vmatprep.subr.bf16.mxu0 %v4414_v34 }
 0x15e   :  { %1524 = vmatpush1.bf16.msra.mxu0 %v4412_v35 }
 0x15f   :  { %1525 = vmatprep.subr.bf16.mxu0 %v4417_v28 }
 0x162   :  { %1526 = vmatpush1.bf16.msra.mxu0 %v4415_v26 }
 0x163   :  { %1527 = vmatprep.subr.bf16.mxu0 %v4420_v29 }
 0x166   :  { %1528 = vmatpush1.bf16.msra.mxu0 %v4418_v30 }
 0x169   :  { %1546 = vmatmul.mubr.bf16.vlgmr.msra.gmra.mrb[0].mxu0 %v1414_v62 }
 0x16a   :  { %1555 = vmatprep.mubr.bf16.mxu0 %v4521_v3 }
 0x171   :  { %1556 = vmatmul.mubr.bf16.gmra.mrb[4].mxu0 %v1415_v55 }
 0x23c   :  { %v5294_v32 = vpop.f32.mrb[0].mxu0 }
 0x23d   :  { %v5296_v24 = vpop.f32.mrb[1].mxu0 }
 0x23e   :  { %v5298_v25 = vpop.f32.mrb[2].mxu0 }
 0x23f   :  { %v1574_v27 = vadd.f32 %v5298_v25, %v5294_v32  ;;  %v5302_v33 = vpop.f32.mrb[3].mxu0 }
 0x240   :  { %v1581_v60 = vadd.f32 %v5302_v33, %v5296_v24 }
 0x241   :  { %v1575_v61 = vrot.slane %v1574_v27, 4 }
 0x242   :  { %v1582_v3 = vrot.slane %v1581_v60, 4 }
 0x243   :  { %v1576_v62 = vadd.f32 %v1575_v61, %v1574_v27  ;;  %v1687_v61 = vshrl.u32 %v15_v54, 7 }
 0x244   :  { %v1583_v36 = vadd.f32 %v1582_v3, %v1581_v60  ;;  %v5306_v53 = vpop.f32.mrb[4].mxu0 }
 0x245   :  { %v1577_v7 = vrot.slane %v1576_v62, 2  ;;  %v5308_v55 = vpop.f32.mrb[5].mxu0 }
 0x246   :  { %v1584_v37 = vrot.slane %v1583_v36, 2  ;;  %v5310_v38 = vpop.f32.mrb[6].mxu0 }
 0x247   :  { %v1588_v41 = vadd.f32 %v5310_v38, %v5306_v53  ;;  %v5314_v42 = vpop.f32.mrb[7].mxu0  ;;  %v1578_v57 = vadd.f32 %v1577_v7, %v1576_v62  ;;  %v5335_v62 = vsub.s32 0, %v1687_v61 }
 0x248   :  { %v1585_v63 = vadd.f32 %v1584_v37, %v1583_v36  ;;  %v1595_v5 = vadd.f32 %v5314_v42, %v5308_v55 }
 0x249   :  { %v1589_v6 = vrot.slane %v1588_v41, 4  ;;  %v1579_v20 = vrot.slane %v1578_v57, 1 }
 0x24a   :  { %v1596_v10 = vrot.slane %v1595_v5, 4  ;;  %v1586_v8 = vrot.slane %v1585_v63, 1 }
 0x24b   :  { %v1590_v9 = vadd.f32 %v1589_v6, %v1588_v41  ;;  %v1580_v44 = vadd.f32 %v1579_v20, %v1578_v57 }
 0x24c   :  { %v1597_v12 = vadd.f32 %v1596_v10, %v1595_v5  ;;  %v1587_v13 = vadd.f32 %v1586_v8, %v1585_v63 }
 0x24d   :  { %v1591_v21 = vrot.slane %v1590_v9, 2 }
 0x24e   :  { %v1598_v11 = vrot.slane %v1597_v12, 2  ;;  %1644 = vrot.lane.b32.xlu0 %v1587_v13, %s4522_s6 }
 0x24f   :  { %v1592_v49 = vadd.f32 %v1591_v21, %v1590_v9 }
 0x250   :  { %v1599_v43 = vadd.f32 %v1598_v11, %v1597_v12 }
 0x251   :  { %v1593_v47 = vrot.slane %v1592_v49, 1 }
 0x252   :  { %1604 = vrot.lane.b32.xlu0 %v1580_v44, %s4522_s6  ;;  %v1600_v45 = vrot.slane %v1599_v43, 1 }
 0x253   :  { %v1594_v48 = vadd.f32 %v1593_v47, %v1592_v49 }
 0x254   :  { %v1601_v46 = vadd.f32 %v1600_v45, %v1599_v43 }
 0x256   :  { %1646 = vrot.lane.b32.xlu1 %v1601_v46, %s4522_s6 }
 0x25a   :  { %1606 = vrot.lane.b32.xlu1 %v1594_v48, %s4522_s6 }
 0x2c0   :  { %v1645_v50 = vpop.permute.xlu0 %1644 }
 0x2c1   :  { %v1650_v58 = vadd.f32 %v1645_v50, %v1587_v13 }
 0x2c3   :  { %1654 = vrot.lane.b32.xlu0 %v1650_v58, %s4524_s1 }
 0x2c4   :  { %v1605_v59 = vpop.permute.xlu0 %1604 }
 0x2c5   :  { %v1610_v22 = vadd.f32 %v1605_v59, %v1580_v44 }
 0x2c7   :  { %1614 = vrot.lane.b32.xlu0 %v1610_v22, %s4524_s1 }
 0x2c8   :  { %v1647_v23 = vpop.permute.xlu1 %1646 }
 0x2c9   :  { %v1651_v31 = vadd.f32 %v1647_v23, %v1601_v46 }
 0x2cb   :  { %1656 = vrot.lane.b32.xlu1 %v1651_v31, %s4524_s1 }
 0x2cc   :  { %v1607_v15 = vpop.permute.xlu1 %1606 }
 0x2cd   :  { %v1611_v14 = vadd.f32 %v1607_v15, %v1594_v48 }
 0x2cf   :  { %1616 = vrot.lane.b32.xlu1 %v1611_v14, %s4524_s1 }
 0x335   :  { %v1655_v16 = vpop.permute.xlu0 %1654 }
 0x336   :  { %v1660_v39 = vadd.f32 %v1655_v16, %v1650_v58 }
 0x338   :  { %1664 = vrot.lane.b32.xlu0 %v1660_v39, %s4525_s22 }
 0x339   :  { %v1615_v40 = vpop.permute.xlu0 %1614 }
 0x33a   :  { %v1620_v17 = vadd.f32 %v1615_v40, %v1610_v22 }
 0x33c   :  { %1624 = vrot.lane.b32.xlu0 %v1620_v17, %s4525_s22 }
 0x33d   :  { %v1657_v18 = vpop.permute.xlu1 %1656 }
 0x33e   :  { %v1661_v19 = vadd.f32 %v1657_v18, %v1651_v31 }
 0x340   :  { %1666 = vrot.lane.b32.xlu1 %v1661_v19, %s4525_s22 }
 0x341   :  { %v1617_v51 = vpop.permute.xlu1 %1616 }
 0x342   :  { %v1621_v52 = vadd.f32 %v1617_v51, %v1611_v14 }
 0x344   :  { %1626 = vrot.lane.b32.xlu1 %v1621_v52, %s4525_s22 }
 0x3aa   :  { %v1665_v34 = vpop.permute.xlu0 %1664 }
 0x3ab   :  { %v1670_v35 = vadd.f32 %v1665_v34, %v1660_v39 }
 0x3ad   :  { %1674 = vrot.lane.b32.xlu0 %v1670_v35, %s4526_s23 }
 0x3ae   :  { %v1625_v28 = vpop.permute.xlu0 %1624 }
 0x3af   :  { %v1630_v26 = vadd.f32 %v1625_v28, %v1620_v17 }
 0x3b1   :  { %1634 = vrot.lane.b32.xlu0 %v1630_v26, %s4526_s23 }
 0x3b2   :  { %v1667_v29 = vpop.permute.xlu1 %1666 }
 0x3b3   :  { %v1671_v30 = vadd.f32 %v1667_v29, %v1661_v19 }
 0x3b5   :  { %1676 = vrot.lane.b32.xlu1 %v1671_v30, %s4526_s23 }
 0x3b6   :  { %v1627_v27 = vpop.permute.xlu1 %1626 }
 0x3b7   :  { %v1631_v60 = vadd.f32 %v1627_v27, %v1621_v52 }
 0x3b9   :  { %1636 = vrot.lane.b32.xlu1 %v1631_v60, %s4526_s23 }
 0x41f   :  { %v1675_v3 = vpop.permute.xlu0 %1674 }
 0x420   :  { %v1680_v36 = vadd.f32 %v1675_v3, %v1670_v35 }
 0x422   :  { %v1683_v7 = vmul.f32 0.00390625, %v1680_v36 }
 0x423   :  { %v1635_v37 = vpop.permute.xlu0 %1634 }
 0x424   :  { %v1693_v41 = vrot.slane %v1683_v7, %v5335_v62  ;;  %v1640_v57 = vadd.f32 %v1635_v37, %v1630_v26 }
 0x426   :  { %v5339_v63 = vsub.f32 %v5296_v24, %v1693_v41  ;;  %v5342_v5 = vsub.f32 %v5302_v33, %v1693_v41  ;;  %v1682_v6 = vmul.f32 0.00390625, %v1640_v57 }
 0x427   :  { %v1677_v10 = vpop.permute.xlu1 %1676 }
 0x428   :  { %v1711_v54 = vmul.f32 %v5339_v63, %v5339_v63  ;;  %v1713_v8 = vmul.f32 %v5342_v5, %v5342_v5  ;;  %v1689_v9 = vrot.slane %v1682_v6, %v5335_v62  ;;  %v1681_v12 = vadd.f32 %v1677_v10, %v1671_v30 }
 0x42a   :  { %v1725_v13 = vadd.f32 %v1713_v8, %v1711_v54  ;;  %v5350_v20 = vsub.f32 %v5294_v32, %v1689_v9  ;;  %v5353_v24 = vsub.f32 %v5298_v25, %v1689_v9  ;;  %v1685_v33 = vmul.f32 0.00390625, %v1681_v12 }
 0x42b   :  { %v1637_v21 = vpop.permute.xlu1 %1636 }
 0x42c   :  { %v1710_v11 = vmul.f32 %v5350_v20, %v5350_v20  ;;  %v1712_v49 = vmul.f32 %v5353_v24, %v5353_v24  ;;  %v1701_v43 = vrot.slane %v1685_v33, %v5335_v62  ;;  %v1641_v44 = vadd.f32 %v1637_v21, %v1631_v60 }
 0x42d   :  { %v1726_v45 = vrot.slane %v1725_v13, 4 }
 0x42e   :  { %v1718_v46 = vadd.f32 %v1712_v49, %v1710_v11  ;;  %v5361_v47 = vsub.f32 %v5308_v55, %v1701_v43  ;;  %v5364_v32 = vsub.f32 %v5314_v42, %v1701_v43  ;;  %v1684_v25 = vmul.f32 0.00390625, %v1641_v44 }
 0x42f   :  { %v1727_v48 = vadd.f32 %v1726_v45, %v1725_v13 }
 0x430   :  { %v1715_v50 = vmul.f32 %v5361_v47, %v5361_v47  ;;  %v1717_v58 = vmul.f32 %v5364_v32, %v5364_v32  ;;  %v1697_v59 = vrot.slane %v1684_v25, %v5335_v62  ;;  %v1719_v22 = vrot.slane %v1718_v46, 4 }
 0x431   :  { %v1728_v23 = vrot.slane %v1727_v48, 2 }
 0x432   :  { %v1739_v31 = vadd.f32 %v1717_v58, %v1715_v50  ;;  %v5372_v15 = vsub.f32 %v5306_v53, %v1697_v59  ;;  %v5375_v55 = vsub.f32 %v5310_v38, %v1697_v59  ;;  %v1720_v42 = vadd.f32 %v1719_v22, %v1718_v46  ;;  %v4421_v22 = vld [vmem:[%s5919_s2 + $0x40] sm:$0xff]  }
 0x433   :  { %v1729_v14 = vadd.f32 %v1728_v23, %v1727_v48  ;;  %3803 = vmatprep.subr.bf16.mxu1 %v4421_v22  ;;  %v4422_v23 = vld [vmem:[%s5919_s2 + $0x48] sm:$0xff]  }
 0x434   :  { %v1714_v16 = vmul.f32 %v5372_v15, %v5372_v15  ;;  %v1716_v39 = vmul.f32 %v5375_v55, %v5375_v55  ;;  %v1721_v40 = vrot.slane %v1720_v42, 2  ;;  %v1740_v17 = vrot.slane %v1739_v31, 4  ;;  %3804 = vmatpush3.bf16.msra.mxu1 %v4421_v22 }
 0x435   :  { %v1730_v18 = vrot.slane %v1729_v14, 1  ;;  %3805 = vmatprep.subr.bf16.mxu1 %v4422_v23 }
 0x436   :  { %v1732_v19 = vadd.f32 %v1716_v39, %v1714_v16  ;;  %v1722_v51 = vadd.f32 %v1721_v40, %v1720_v42  ;;  %v1741_v52 = vadd.f32 %v1740_v17, %v1739_v31  ;;  %v4423_v31 = vld [vmem:[%s5919_s2 + $0x50] sm:$0xff]   ;;  %v4424_v42 = vld [vmem:[%s5919_s2 + $0x58] sm:$0xff]   ;;  %v4426_v16 = vld [vmem:[%s5919_s2 + $0x68] sm:$0xff]  }
 0x437   :  { %v1731_v34 = vadd.f32 %v1730_v18, %v1729_v14  ;;  %v4425_v14 = vld [vmem:[%s5919_s2 + $0x60] sm:$0xff]   ;;  %v4427_v39 = vld [vmem:[%s5919_s2 + $0x70] sm:$0xff]   ;;  %v4428_v40 = vld [vmem:[%s5919_s2 + $0x78] sm:$0xff]  }
 0x438   :  { %v1723_v53 = vrot.slane %v1722_v51, 1  ;;  %v1742_v35 = vrot.slane %v1741_v52, 2  ;;  %v1733_v28 = vrot.slane %v1732_v19, 4  ;;  %3806 = vmatpush3.bf16.msra.mxu1 %v4422_v23  ;;  %v5424_v17 = vld [vmem:[%s5919_s2] sm:$0xff]  }
 0x439   :  { %1788 = vrot.lane.b32.xlu0 %v1731_v34, %s4522_s6  ;;  %3807 = vmatprep.subr.bf16.mxu1 %v4423_v31 }
 0x43a   :  { %v1724_v38 = vadd.f32 %v1723_v53, %v1722_v51  ;;  %v1743_v26 = vadd.f32 %v1742_v35, %v1741_v52  ;;  %v1734_v29 = vadd.f32 %v1733_v28, %v1732_v19 }
 0x43c   :  { %v1744_v30 = vrot.slane %v1743_v26, 1  ;;  %v1735_v27 = vrot.slane %v1734_v29, 2  ;;  %3808 = vmatpush3.bf16.msra.mxu1 %v4423_v31 }
 0x43d   :  { %1748 = vrot.lane.b32.xlu0 %v1724_v38, %s4522_s6  ;;  %3809 = vmatprep.subr.bf16.mxu1 %v4424_v42 }
 0x43e   :  { %v1745_v60 = vadd.f32 %v1744_v30, %v1743_v26  ;;  %v1736_v61 = vadd.f32 %v1735_v27, %v1734_v29 }
 0x440   :  { %1790 = vrot.lane.b32.xlu1 %v1745_v60, %s4522_s6  ;;  %v1737_v3 = vrot.slane %v1736_v61, 1  ;;  %3810 = vmatpush3.bf16.msra.mxu1 %v4424_v42 }
 0x441   :  { %3811 = vmatprep.subr.bf16.mxu1 %v4425_v14 }
 0x442   :  { %v1738_v36 = vadd.f32 %v1737_v3, %v1736_v61 }
 0x444   :  { %1750 = vrot.lane.b32.xlu1 %v1738_v36, %s4522_s6  ;;  %3812 = vmatpush3.bf16.msra.mxu1 %v4425_v14 }
 0x445   :  { %3813 = vmatprep.subr.bf16.mxu1 %v4426_v16 }
 0x448   :  { %3814 = vmatpush3.bf16.msra.mxu1 %v4426_v16 }
 0x449   :  { %3815 = vmatprep.subr.bf16.mxu1 %v4427_v39 }
 0x44c   :  { %3816 = vmatpush3.bf16.msra.mxu1 %v4427_v39 }
 0x44d   :  { %3817 = vmatprep.subr.bf16.mxu1 %v4428_v40 }
 0x450   :  { %3818 = vmatpush3.bf16.msra.mxu1 %v4428_v40 }
 0x451   :  { %3823 = vmatprep.subr.bf16.mxu1 %v5424_v17 }
 0x4ab   :  { %v1789_v7 = vpop.permute.xlu0 %1788 }
 0x4ac   :  { %v1794_v37 = vadd.f32 %v1789_v7, %v1731_v34 }
 0x4ae   :  { %1798 = vrot.lane.b32.xlu0 %v1794_v37, %s4524_s1 }
 0x4af   :  { %v1749_v41 = vpop.permute.xlu0 %1748 }
 0x4b0   :  { %v1754_v57 = vadd.f32 %v1749_v41, %v1724_v38 }
 0x4b2   :  { %1758 = vrot.lane.b32.xlu0 %v1754_v57, %s4524_s1  ;;  %v1791_v6 = vpop.permute.xlu1 %1790 }
 0x4b3   :  { %v1795_v10 = vadd.f32 %v1791_v6, %v1745_v60 }
 0x4b5   :  { %1800 = vrot.lane.b32.xlu1 %v1795_v10, %s4524_s1 }
 0x4b6   :  { %v1751_v54 = vpop.permute.xlu1 %1750 }
 0x4b7   :  { %v1755_v8 = vadd.f32 %v1751_v54, %v1738_v36 }
 0x4b9   :  { %1760 = vrot.lane.b32.xlu1 %v1755_v8, %s4524_s1 }
 0x520   :  { %v1799_v9 = vpop.permute.xlu0 %1798 }
 0x521   :  { %v1804_v12 = vadd.f32 %v1799_v9, %v1794_v37 }
 0x523   :  { %1808 = vrot.lane.b32.xlu0 %v1804_v12, %s4525_s22 }
 0x524   :  { %v1759_v13 = vpop.permute.xlu0 %1758 }
 0x525   :  { %v1764_v33 = vadd.f32 %v1759_v13, %v1754_v57 }
 0x527   :  { %1768 = vrot.lane.b32.xlu0 %v1764_v33, %s4525_s22  ;;  %v1801_v21 = vpop.permute.xlu1 %1800 }
 0x528   :  { %v1805_v11 = vadd.f32 %v1801_v21, %v1795_v10 }
 0x52a   :  { %1810 = vrot.lane.b32.xlu1 %v1805_v11, %s4525_s22 }
 0x52b   :  { %v1761_v49 = vpop.permute.xlu1 %1760 }
 0x52c   :  { %v1765_v43 = vadd.f32 %v1761_v49, %v1755_v8 }
 0x52e   :  { %1770 = vrot.lane.b32.xlu1 %v1765_v43, %s4525_s22 }
 0x595   :  { %v1809_v44 = vpop.permute.xlu0 %1808 }
 0x596   :  { %v1814_v45 = vadd.f32 %v1809_v44, %v1804_v12 }
 0x598   :  { %1818 = vrot.lane.b32.xlu0 %v1814_v45, %s4526_s23 }
 0x599   :  { %v1769_v46 = vpop.permute.xlu0 %1768 }
 0x59a   :  { %v1774_v25 = vadd.f32 %v1769_v46, %v1764_v33 }
 0x59c   :  { %1778 = vrot.lane.b32.xlu0 %v1774_v25, %s4526_s23  ;;  %v1811_v48 = vpop.permute.xlu1 %1810 }
 0x59d   :  { %v1815_v50 = vadd.f32 %v1811_v48, %v1805_v11 }
 0x59f   :  { %1820 = vrot.lane.b32.xlu1 %v1815_v50, %s4526_s23 }
 0x5a0   :  { %v1771_v58 = vpop.permute.xlu1 %1770 }
 0x5a1   :  { %v1775_v59 = vadd.f32 %v1771_v58, %v1765_v43 }
 0x5a3   :  { %1780 = vrot.lane.b32.xlu1 %v1775_v59, %s4526_s23 }
 0x60a   :  { %v1819_v18 = vpop.permute.xlu0 %1818 }
 0x60b   :  { %v1824_v19 = vadd.f32 %v1819_v18, %v1814_v45 }
 0x60d   :  { %v1827_v51 = vmul.f32 0.00390625, %v1824_v19 }
 0x60e   :  { %v1779_v38 = vpop.permute.xlu0 %1778 }
 0x60f   :  { %v1831_v52 = vadd.f32 1e-05, %v1827_v51  ;;  %v1784_v30 = vadd.f32 %v1779_v38, %v1774_v25 }
 0x611   :  { %4493 = vrsqrt.f32 %v1831_v52  ;;  %v1821_v34 = vpop.permute.xlu1 %1820  ;;  %v1826_v36 = vmul.f32 0.00390625, %v1784_v30 }
 0x612   :  { %v1825_v53 = vadd.f32 %v1821_v34, %v1815_v50 }
 0x613   :  { %v1830_v54 = vadd.f32 1e-05, %v1826_v36 }
 0x614   :  { %v1829_v35 = vmul.f32 0.00390625, %v1825_v53 }
 0x615   :  { %v1781_v7 = vpop.permute.xlu1 %1780 }
 0x616   :  { %v1833_v28 = vadd.f32 1e-05, %v1829_v35  ;;  %v1785_v10 = vadd.f32 %v1781_v7, %v1775_v59  ;;  %v4431_v7 = vld [vmem:[%s5919_s2 + $0x10] sm:$0xff]  }
 0x618   :  { %4495 = vrsqrt.f32 %v1833_v28 }
 0x61b   :  { %v4494_v26 = vpop.eup %4493 }
 0x61c   :  { %v1845_v29 = vrot.slane %v4494_v26, %v5335_v62 }
 0x61e   :  { %v1855_v27 = vmul.f32 %v1845_v29, %v5339_v63  ;;  %v1857_v60 = vmul.f32 %v1845_v29, %v5342_v5  ;;  %v1828_v5 = vmul.f32 0.00390625, %v1785_v10  ;;  %v4434_v10 = vld [vmem:[%s5919_s2 + $0x28] sm:$0xff]  }
 0x620   :  { %v1862_v61 = vsub.f32 0.0, %v1855_v27  ;;  %v1863_v3 = vsub.f32 0.0, %v1857_v60  ;;  %v1832_v21 = vadd.f32 1e-05, %v1828_v5 }
 0x622   :  { %v4496_v37 = vpop.eup %4495  ;;  %v1866_v41 = vmul.f32 1.442695, %v1862_v61  ;;  %v1868_v57 = vmul.f32 1.442695, %v1863_v3  ;;  %v4430_v61 = vld [vmem:[%s5919_s2 + $0x8] sm:$0xff]  }
 0x623   :  { %v1853_v6 = vrot.slane %v4496_v37, %v5335_v62 }
 0x624   :  { %4497 = vpow2.f32 %v1866_v41  ;;  %v4432_v41 = vld [vmem:[%s5919_s2 + $0x18] sm:$0xff]  }
 0x625   :  { %4499 = vpow2.f32 %v1868_v57  ;;  %v1859_v8 = vmul.f32 %v1853_v6, %v5361_v47  ;;  %v1861_v9 = vmul.f32 %v1853_v6, %v5364_v32  ;;  %v4433_v57 = vld [vmem:[%s5919_s2 + $0x20] sm:$0xff]  }
 0x626   :  { %4501 = vrsqrt.f32 %v1830_v54  ;;  %v4435_v54 = vld [vmem:[%s5919_s2 + $0x30] sm:$0xff]  }
 0x627   :  { %v1864_v63 = vsub.f32 0.0, %v1859_v8  ;;  %v1865_v12 = vsub.f32 0.0, %v1861_v9  ;;  %v4436_v8 = vld [vmem:[%s5919_s2 + $0x38] sm:$0xff]   ;;  %v4437_v9 = vld [vmem:[%s5919_s2 + $0x80] sm:$0xff]  }
 0x629   :  { %v1870_v13 = vmul.f32 1.442695, %v1864_v63  ;;  %v1872_v33 = vmul.f32 1.442695, %v1865_v12 }
 0x62b   :  { %4503 = vpow2.f32 %v1870_v13 }
 0x62c   :  { %4505 = vpow2.f32 %v1872_v33 }
 0x62d   :  { %4507 = vrsqrt.f32 %v1832_v21 }
 0x62e   :  { %v4498_v11 = vpop.eup %4497 }
 0x62f   :  { %v4500_v49 = vpop.eup %4499  ;;  %v1874_v43 = vadd.f32 1.0, %v4498_v11 }
 0x630   :  { %v1875_v44 = vadd.f32 1.0, %v4500_v49  ;;  %v4502_v45 = vpop.eup %4501 }
 0x631   :  { %4509 = vrcp.f32 %v1874_v43  ;;  %v1841_v32 = vrot.slane %v4502_v45, %v5335_v62 }
 0x632   :  { %4511 = vrcp.f32 %v1875_v44 }
 0x633   :  { %v1854_v58 = vmul.f32 %v1841_v32, %v5350_v20  ;;  %v1856_v22 = vmul.f32 %v1841_v32, %v5353_v24 }
 0x635   :  { %v4504_v47 = vpop.eup %4503 }
 0x636   :  { %v4506_v46 = vpop.eup %4505  ;;  %v1876_v25 = vadd.f32 1.0, %v4504_v47 }
 0x637   :  { %v1877_v48 = vadd.f32 1.0, %v4506_v46  ;;  %v4508_v50 = vpop.eup %4507 }
 0x638   :  { %4513 = vrcp.f32 %v1876_v25  ;;  %v1849_v14 = vrot.slane %v4508_v50, %v5335_v62 }
 0x639   :  { %4515 = vrcp.f32 %v1877_v48 }
 0x63a   :  { %v1858_v24 = vmul.f32 %v1849_v14, %v5372_v15  ;;  %v1860_v39 = vmul.f32 %v1849_v14, %v5375_v55 }
 0x63b   :  { %v4510_v59 = vpop.eup %4509 }
 0x63c   :  { %v4512_v23 = vpop.eup %4511  ;;  %v5436_v31 = vmul.f32 %v4510_v59, %v1854_v58 }
 0x63d   :  { %v5438_v42 = vmul.f32 %v4512_v23, %v1856_v22 }
 0x63e   :  { %1886 = vst [vmem:[#allocation2 + $0x1] sm:$0xff] %v5436_v31  ;;  %1890 = vst [vmem:[#allocation2 - $0x1] sm:$0x2] %v5436_v31 }
 0x63f   :  { %1887 = vst [vmem:[#allocation2 + $0x9] sm:$0xff] %v5438_v42  ;;  %1892 = vst [vmem:[#allocation2 + $0xb] sm:$0x40] %v5438_v42  ;;  %v2445_v20 = vpack.c.bf16 %v5438_v42, %v5436_v31  ;;  %v4170_v36 = vpack.i.bf16 %v5438_v42, %v5436_v31  ;;  %v4458_v31 = vld [vmem:[%s5919_s2 + $0x128] sm:$0xff]   ;;  %v4459_v42 = vld [vmem:[%s5919_s2 + $0x130] sm:$0xff]  }
 0x642   :  { %v4514_v16 = vpop.eup %4513 }
 0x643   :  { %v4516_v40 = vpop.eup %4515  ;;  %v5449_v18 = vmul.f32 %v4514_v16, %v1858_v24  ;;  %v4438_v16 = vld [vmem:[%s5919_s2 + $0x88] sm:$0xff]  }
 0x644   :  { %v5451_v19 = vmul.f32 %v4516_v40, %v1860_v39 }
 0x645   :  { %1888 = vst [vmem:[#allocation2 + $0x19] sm:$0xff] %v5449_v18  ;;  %1891 = vst [vmem:[#allocation2 + $0x17] sm:$0x2] %v5449_v18  ;;  %v1894_v51 = vld [vmem:[#allocation2] sm:$0xff] }
 0x646   :  { %1889 = vst [vmem:[#allocation2 + $0x21] sm:$0xff] %v5451_v19  ;;  %1893 = vst [vmem:[#allocation2 + $0x23] sm:$0x40] %v5451_v19  ;;  %v1895_v52 = vld [vmem:[#allocation2 + $0x8] sm:$0xff]  ;;  %v2446_v55 = vpack.c.bf16 %v5451_v19, %v5449_v18  ;;  %v4180_v37 = vpack.i.bf16 %v5451_v19, %v5449_v18  ;;  %v4465_v18 = vld [vmem:[%s5919_s2 + $0x160] sm:$0xff]  }
 0x647   :  { %v5457_v34 = vld [vmem:[#allocation2 + $0x2] sm:$0xff]  ;;  %v5459_v15 = vld [vmem:[#allocation2 + $0xa] sm:$0xff]  ;;  %v4145_v53 = vpack.i.bf16 %v1895_v52, %v1894_v51  ;;  %v1952_v35 = vpack.c.bf16 %v1895_v52, %v1894_v51 }
 0x648   :  { %v2845_v28 = vpack.c.bf16 %v5459_v15, %v5457_v34  ;;  %v4466_v19 = vld [vmem:[%s5919_s2 + $0x168] sm:$0xff]  }
 0x649   :  { %4146 = vrot.lane.b32.xlu0 %v4145_v53, %s4522_s6  ;;  %3819 = vmatprep.mubr.bf16.mxu1 %v1952_v35 }
 0x64a   :  { %4151 = vrot.lane.b32.xlu1 %v4145_v53, %s4523_s11 }
 0x64c   :  { %v1896_v38 = vld [vmem:[#allocation2 + $0x18] sm:$0xff] }
 0x64d   :  { %v1897_v26 = vld [vmem:[#allocation2 + $0x20] sm:$0xff] }
 0x64e   :  { %v5467_v29 = vld [vmem:[#allocation2 + $0x1a] sm:$0xff]  ;;  %v5469_v30 = vld [vmem:[#allocation2 + $0x22] sm:$0xff]  ;;  %v4160_v27 = vpack.i.bf16 %v1897_v26, %v1896_v38  ;;  %v1953_v60 = vpack.c.bf16 %v1897_v26, %v1896_v38  ;;  %v4439_v26 = vld [vmem:[%s5919_s2 + $0x90] sm:$0xff]  }
 0x64f   :  { %v2846_v3 = vpack.c.bf16 %v5469_v30, %v5467_v29  ;;  %v4200_v6 = vpack.i.bf16 %v5469_v30, %v5467_v29  ;;  %v4489_v29 = vld [vmem:[%s5919_s2 + $0x220] sm:$0xff]   ;;  %v4490_v30 = vld [vmem:[%s5919_s2 + $0x228] sm:$0xff]  }
 0x650   :  { %4161 = vrot.lane.b32.xlu1 %v4160_v27, %s4523_s11  ;;  %4156 = vrot.lane.b32.xlu0 %v4160_v27, %s4522_s6 }
 0x651   :  { %3820 = vmatmul.mubr.bf16.vlgmr.msra.gmra.mrb[0].mxu1 %v1953_v60 }
 0x652   :  { %3824 = vmatpush3.bf16.msra.mxu1 %v5424_v17  ;;  %v4190_v17 = vpack.i.bf16 %v5459_v15, %v5457_v34  ;;  %v4482_v34 = vld [vmem:[%s5919_s2 + $0x1e8] sm:$0xff]   ;;  %v4483_v15 = vld [vmem:[%s5919_s2 + $0x1f0] sm:$0xff]  }
 0x653   :  { %3825 = vmatprep.subr.bf16.mxu1 %v4430_v61 }
 0x654   :  { %4171 = vrot.lane.b32.xlu1 %v4170_v36, %s4523_s11  ;;  %4166 = vrot.lane.b32.xlu0 %v4170_v36, %s4522_s6 }
 0x656   :  { %3826 = vmatpush3.bf16.msra.mxu1 %v4430_v61 }
 0x657   :  { %3827 = vmatprep.subr.bf16.mxu1 %v4431_v7 }
 0x658   :  { %4181 = vrot.lane.b32.xlu1 %v4180_v37, %s4523_s11  ;;  %4176 = vrot.lane.b32.xlu0 %v4180_v37, %s4522_s6 }
 0x65a   :  { %3828 = vmatpush3.bf16.msra.mxu1 %v4431_v7 }
 0x65b   :  { %3829 = vmatprep.subr.bf16.mxu1 %v4432_v41 }
 0x65c   :  { %4191 = vrot.lane.b32.xlu1 %v4190_v17, %s4523_s11  ;;  %4186 = vrot.lane.b32.xlu0 %v4190_v17, %s4522_s6 }
 0x65e   :  { %3830 = vmatpush3.bf16.msra.mxu1 %v4432_v41 }
 0x65f   :  { %3831 = vmatprep.subr.bf16.mxu1 %v4433_v57 }
 0x660   :  { %4201 = vrot.lane.b32.xlu1 %v4200_v6, %s4523_s11  ;;  %4196 = vrot.lane.b32.xlu0 %v4200_v6, %s4522_s6 }
 0x662   :  { %3832 = vmatpush3.bf16.msra.mxu1 %v4433_v57 }
 0x663   :  { %3833 = vmatprep.subr.bf16.mxu1 %v4434_v10 }
 0x666   :  { %3834 = vmatpush3.bf16.msra.mxu1 %v4434_v10 }
 0x667   :  { %3835 = vmatprep.subr.bf16.mxu1 %v4435_v54 }
 0x66a   :  { %3836 = vmatpush3.bf16.msra.mxu1 %v4435_v54  ;;  %v4440_v54 = vld [vmem:[%s5919_s2 + $0x98] sm:$0xff]  }
 0x66b   :  { %3837 = vmatprep.subr.bf16.mxu1 %v4436_v8 }
 0x66e   :  { %3838 = vmatpush3.bf16.msra.mxu1 %v4436_v8 }
 0x66f   :  { %3843 = vmatprep.subr.bf16.mxu1 %v4437_v9 }
 0x6bb   :  { %v4147_v63 = vpop.permute.xlu0 %4146 }
 0x6bc   :  { %v4149_v12 = vunpack.i.h.bf16 %v4147_v63  ;;  %v4148_v5 = vunpack.i.l.bf16 %v4147_v63  ;;  %v4152_v13 = vpop.permute.xlu1 %4151 }
 0x6bd   :  { %v4154_v33 = vunpack.i.h.bf16 %v4152_v13  ;;  %v4153_v21 = vunpack.i.l.bf16 %v4152_v13 }
 0x6bf   :  { %v1926_v11 = vsel %vm17_vm0, %v4148_v5, %v4153_v21  ;;  %v1927_v49 = vsel %vm17_vm0, %v4149_v12, %v4154_v33  ;;  %v1930_v47 = vsel %vm18_vm1, %v4153_v21, %v4148_v5  ;;  %v1931_v46 = vsel %vm18_vm1, %v4154_v33, %v4149_v12 }
 0x6c0   :  { %v1934_v43 = vpack.c.bf16 %v1927_v49, %v1926_v11  ;;  %v2165_v24 = vpack.c.bf16 %v1931_v46, %v1930_v47  ;;  %v4441_v11 = vld [vmem:[%s5919_s2 + $0xa0] sm:$0xff]  }
 0x6c2   :  { %3839 = vmatprep.mubr.bf16.mxu1 %v1934_v43  ;;  %v5520_v44 = vpop.permute.xlu0 %4156  ;;  %v5522_v45 = vpop.permute.xlu1 %4161 }
 0x6c3   :  { %v4159_v32 = vunpack.i.h.bf16 %v5520_v44  ;;  %v4158_v25 = vunpack.i.l.bf16 %v5520_v44  ;;  %v4164_v48 = vunpack.i.h.bf16 %v5522_v45  ;;  %v4163_v50 = vunpack.i.l.bf16 %v5522_v45  ;;  %v4447_v44 = vld [vmem:[%s5919_s2 + $0xd0] sm:$0xff]   ;;  %v4448_v45 = vld [vmem:[%s5919_s2 + $0xd8] sm:$0xff]  }
 0x6c5   :  { %v1929_v58 = vsel %vm17_vm0, %v4159_v32, %v4164_v48  ;;  %v1928_v59 = vsel %vm17_vm0, %v4158_v25, %v4163_v50 }
 0x6c6   :  { %v1935_v22 = vpack.c.bf16 %v1929_v58, %v1928_v59  ;;  %v5544_v23 = vpop.permute.xlu0 %4166  ;;  %v5546_v14 = vpop.permute.xlu1 %4171 }
 0x6c7   :  { %v4169_v39 = vunpack.i.h.bf16 %v5544_v23  ;;  %v4168_v40 = vunpack.i.l.bf16 %v5544_v23  ;;  %v4174_v51 = vunpack.i.h.bf16 %v5546_v14  ;;  %v4173_v52 = vunpack.i.l.bf16 %v5546_v14  ;;  %v4442_v14 = vld [vmem:[%s5919_s2 + $0xa8] sm:$0xff]  }
 0x6c8   :  { %3840 = vmatmul.mubr.bf16.vlgmr.msra.gmra.mrb[0].mxu1 %v1935_v22 }
 0x6c9   :  { %3844 = vmatpush3.bf16.msra.mxu1 %v4437_v9  ;;  %3859 = vmatprep.mubr.bf16.mxu1 %v2165_v24  ;;  %v5557_v53 = vsel %vm18_vm1, %v4173_v52, %v4168_v40  ;;  %v5568_v27 = vsel %vm18_vm1, %v4174_v51, %v4169_v39  ;;  %v4443_v24 = vld [vmem:[%s5919_s2 + $0xb0] sm:$0xff]  }
 0x6ca   :  { %v5559_v35 = vpop.permute.xlu0 %4176  ;;  %v5561_v38 = vpop.permute.xlu1 %4181  ;;  %3845 = vmatprep.subr.bf16.mxu1 %v4438_v16  ;;  %v2565_v37 = vpack.c.bf16 %v5568_v27, %v5557_v53  ;;  %v4468_v53 = vld [vmem:[%s5919_s2 + $0x178] sm:$0xff]   ;;  %v4469_v27 = vld [vmem:[%s5919_s2 + $0x180] sm:$0xff]  }
 0x6cb   :  { %v4179_v60 = vunpack.i.h.bf16 %v5559_v35  ;;  %v4178_v61 = vunpack.i.l.bf16 %v5559_v35  ;;  %v4184_v36 = vunpack.i.h.bf16 %v5561_v38  ;;  %v4183_v7 = vunpack.i.l.bf16 %v5561_v38  ;;  %v4455_v35 = vld [vmem:[%s5919_s2 + $0x110] sm:$0xff]   ;;  %v4456_v38 = vld [vmem:[%s5919_s2 + $0x118] sm:$0xff]  }
 0x6cd   :  { %v5582_v41 = vsel %vm18_vm1, %v4184_v36, %v4179_v60  ;;  %v5590_v17 = vsel %vm18_vm1, %v4183_v7, %v4178_v61  ;;  %3846 = vmatpush3.bf16.msra.mxu1 %v4438_v16  ;;  %v4444_v16 = vld [vmem:[%s5919_s2 + $0xb8] sm:$0xff]  }
 0x6ce   :  { %v2566_v57 = vpack.c.bf16 %v5582_v41, %v5590_v17  ;;  %v5594_v6 = vpop.permute.xlu0 %4186  ;;  %v5596_v10 = vpop.permute.xlu1 %4191  ;;  %3847 = vmatprep.subr.bf16.mxu1 %v4439_v26  ;;  %v4473_v41 = vld [vmem:[%s5919_s2 + $0x1a0] sm:$0xff]   ;;  %v4474_v17 = vld [vmem:[%s5919_s2 + $0x1a8] sm:$0xff]  }
 0x6cf   :  { %v4189_v8 = vunpack.i.h.bf16 %v5594_v6  ;;  %v4188_v9 = vunpack.i.l.bf16 %v5594_v6  ;;  %v4194_v63 = vunpack.i.h.bf16 %v5596_v10  ;;  %v4193_v12 = vunpack.i.l.bf16 %v5596_v10  ;;  %v4471_v6 = vld [vmem:[%s5919_s2 + $0x190] sm:$0xff]   ;;  %v4472_v10 = vld [vmem:[%s5919_s2 + $0x198] sm:$0xff]  }
 0x6d1   :  { %3848 = vmatpush3.bf16.msra.mxu1 %v4439_v26  ;;  %v5611_v5 = vsel %vm18_vm1, %v4193_v12, %v4188_v9  ;;  %v5619_v13 = vsel %vm18_vm1, %v4194_v63, %v4189_v8  ;;  %v4445_v26 = vld [vmem:[%s5919_s2 + $0xc0] sm:$0xff]  }
 0x6d2   :  { %v5621_v33 = vpop.permute.xlu0 %4196  ;;  %v5623_v21 = vpop.permute.xlu1 %4201  ;;  %3849 = vmatprep.subr.bf16.mxu1 %v4440_v54  ;;  %v2965_v49 = vpack.c.bf16 %v5619_v13, %v5611_v5  ;;  %v4492_v5 = vld [vmem:[%s5919_s2 + $0x238] sm:$0xff]  }
 0x6d3   :  { %v4199_v43 = vunpack.i.h.bf16 %v5621_v33  ;;  %v4198_v47 = vunpack.i.l.bf16 %v5621_v33  ;;  %v4204_v46 = vunpack.i.h.bf16 %v5623_v21  ;;  %v4203_v58 = vunpack.i.l.bf16 %v5623_v21  ;;  %v4479_v33 = vld [vmem:[%s5919_s2 + $0x1d0] sm:$0xff]   ;;  %v4481_v21 = vld [vmem:[%s5919_s2 + $0x1e0] sm:$0xff]  }
 0x6d5   :  { %v5640_v59 = vsel %vm18_vm1, %v4204_v46, %v4199_v43  ;;  %v5648_v22 = vsel %vm18_vm1, %v4203_v58, %v4198_v47  ;;  %3850 = vmatpush3.bf16.msra.mxu1 %v4440_v54  ;;  %v1933_v54 = vsel %vm18_vm1, %v4164_v48, %v4159_v32  ;;  %v4446_v32 = vld [vmem:[%s5919_s2 + $0xc8] sm:$0xff]  }
 0x6d6   :  { %3851 = vmatprep.subr.bf16.mxu1 %v4441_v11  ;;  %v5921_v13 = vpack.c.bf16 %v5640_v59, %v5648_v22 }
 0x6d9   :  { %3852 = vmatpush3.bf16.msra.mxu1 %v4441_v11  ;;  %v1932_v11 = vsel %vm18_vm1, %v4163_v50, %v4158_v25  ;;  %v4449_v25 = vld [vmem:[%s5919_s2 + $0xe0] sm:$0xff]   ;;  %v4450_v50 = vld [vmem:[%s5919_s2 + $0xe8] sm:$0xff]  }
 0x6da   :  { %3853 = vmatprep.subr.bf16.mxu1 %v4442_v14  ;;  %v2166_v23 = vpack.c.bf16 %v1933_v54, %v1932_v11  ;;  %v4464_v54 = vld [vmem:[%s5919_s2 + $0x158] sm:$0xff]   ;;  %v2718_v11 = vsel %vm17_vm0, %v4189_v8, %v4194_v63  ;;  %v2720_v63 = vsel %vm17_vm0, %v4199_v43, %v4204_v46  ;;  %v4485_v43 = vld [vmem:[%s5919_s2 + $0x200] sm:$0xff]   ;;  %v4487_v46 = vld [vmem:[%s5919_s2 + $0x210] sm:$0xff]  }
 0x6db   :  { %v4476_v8 = vld [vmem:[%s5919_s2 + $0x1b8] sm:$0xff]  }
 0x6dd   :  { %3854 = vmatpush3.bf16.msra.mxu1 %v4442_v14  ;;  %v2317_v14 = vsel %vm17_vm0, %v4168_v40, %v4173_v52  ;;  %v4452_v40 = vld [vmem:[%s5919_s2 + $0xf8] sm:$0xff]   ;;  %v2320_v52 = vsel %vm17_vm0, %v4179_v60, %v4184_v36  ;;  %v4457_v60 = vld [vmem:[%s5919_s2 + $0x120] sm:$0xff]   ;;  %v4462_v36 = vld [vmem:[%s5919_s2 + $0x148] sm:$0xff]  }
 0x6de   :  { %3855 = vmatprep.subr.bf16.mxu1 %v4443_v24 }
 0x6e1   :  { %3856 = vmatpush3.bf16.msra.mxu1 %v4443_v24  ;;  %v2318_v24 = vsel %vm17_vm0, %v4169_v39, %v4174_v51  ;;  %v4451_v39 = vld [vmem:[%s5919_s2 + $0xf0] sm:$0xff]   ;;  %v4453_v51 = vld [vmem:[%s5919_s2 + $0x100] sm:$0xff]  }
 0x6e2   :  { %3857 = vmatprep.subr.bf16.mxu1 %v4444_v16  ;;  %v2325_v48 = vpack.c.bf16 %v2318_v24, %v2317_v14  ;;  %v4470_v14 = vld [vmem:[%s5919_s2 + $0x188] sm:$0xff]  }
 0x6e5   :  { %3858 = vmatpush3.bf16.msra.mxu1 %v4444_v16 }
 0x6e6   :  { %3863 = vmatprep.subr.bf16.mxu1 %v4445_v26 }
 0x6e8   :  { %3860 = vmatmul.mubr.bf16.vlgmr.msra.gmra.mrb[0].mxu1 %v2166_v23  ;;  %v2319_v23 = vsel %vm17_vm0, %v4178_v61, %v4183_v7  ;;  %v4461_v61 = vld [vmem:[%s5919_s2 + $0x140] sm:$0xff]   ;;  %v4463_v7 = vld [vmem:[%s5919_s2 + $0x150] sm:$0xff]  }
 0x6e9   :  { %3864 = vmatpush3.bf16.msra.mxu1 %v4445_v26  ;;  %3879 = vmatprep.mubr.bf16.mxu1 %v2325_v48  ;;  %v2326_v16 = vpack.c.bf16 %v2320_v52, %v2319_v23  ;;  %v4454_v26 = vld [vmem:[%s5919_s2 + $0x108] sm:$0xff]  }
 0x6ea   :  { %3865 = vmatprep.subr.bf16.mxu1 %v4446_v32  ;;  %v4478_v48 = vld [vmem:[%s5919_s2 + $0x1c8] sm:$0xff]  }
 0x6ed   :  { %3866 = vmatpush3.bf16.msra.mxu1 %v4446_v32 }
 0x6ee   :  { %3867 = vmatprep.subr.bf16.mxu1 %v4447_v44 }
 0x6f1   :  { %3868 = vmatpush3.bf16.msra.mxu1 %v4447_v44 }
 0x6f2   :  { %3869 = vmatprep.subr.bf16.mxu1 %v4448_v45 }
 0x6f5   :  { %3870 = vmatpush3.bf16.msra.mxu1 %v4448_v45 }
 0x6f6   :  { %3871 = vmatprep.subr.bf16.mxu1 %v4449_v25 }
 0x6f9   :  { %3872 = vmatpush3.bf16.msra.mxu1 %v4449_v25 }
 0x6fa   :  { %3873 = vmatprep.subr.bf16.mxu1 %v4450_v50 }
 0x6fd   :  { %3874 = vmatpush3.bf16.msra.mxu1 %v4450_v50 }
 0x6fe   :  { %3875 = vmatprep.subr.bf16.mxu1 %v4451_v39 }
 0x701   :  { %3876 = vmatpush3.bf16.msra.mxu1 %v4451_v39 }
 0x702   :  { %3877 = vmatprep.subr.bf16.mxu1 %v4452_v40 }
 0x705   :  { %3878 = vmatpush3.bf16.msra.mxu1 %v4452_v40 }
 0x706   :  { %3883 = vmatprep.subr.bf16.mxu1 %v4453_v51 }
 0x708   :  { %3880 = vmatmul.mubr.bf16.vlgmr.msra.gmra.mrb[0].mxu1 %v2326_v16 }
 0x709   :  { %3884 = vmatpush3.bf16.msra.mxu1 %v4453_v51  ;;  %3899 = vmatprep.mubr.bf16.mxu1 %v2445_v20  ;;  %v4460_v20 = vld [vmem:[%s5919_s2 + $0x138] sm:$0xff]  }
 0x70a   :  { %3885 = vmatprep.subr.bf16.mxu1 %v4454_v26 }
 0x70d   :  { %3886 = vmatpush3.bf16.msra.mxu1 %v4454_v26 }
 0x70e   :  { %3887 = vmatprep.subr.bf16.mxu1 %v4455_v35 }
 0x711   :  { %3888 = vmatpush3.bf16.msra.mxu1 %v4455_v35 }
 0x712   :  { %3889 = vmatprep.subr.bf16.mxu1 %v4456_v38 }
 0x715   :  { %3890 = vmatpush3.bf16.msra.mxu1 %v4456_v38 }
 0x716   :  { %3891 = vmatprep.subr.bf16.mxu1 %v4457_v60 }
 0x719   :  { %3892 = vmatpush3.bf16.msra.mxu1 %v4457_v60 }
 0x71a   :  { %3893 = vmatprep.subr.bf16.mxu1 %v4458_v31 }
 0x71d   :  { %3894 = vmatpush3.bf16.msra.mxu1 %v4458_v31 }
 0x71e   :  { %3895 = vmatprep.subr.bf16.mxu1 %v4459_v42 }
 0x721   :  { %3896 = vmatpush3.bf16.msra.mxu1 %v4459_v42 }
 0x722   :  { %3897 = vmatprep.subr.bf16.mxu1 %v4460_v20 }
 0x725   :  { %3898 = vmatpush3.bf16.msra.mxu1 %v4460_v20 }
 0x726   :  { %3903 = vmatprep.subr.bf16.mxu1 %v4461_v61 }
 0x728   :  { %3900 = vmatmul.mubr.bf16.vlgmr.msra.gmra.mrb[0].mxu1 %v2446_v55  ;;  %v4467_v55 = vld [vmem:[%s5919_s2 + $0x170] sm:$0xff]  }
 0x729   :  { %3904 = vmatpush3.bf16.msra.mxu1 %v4461_v61  ;;  %3919 = vmatprep.mubr.bf16.mxu1 %v2565_v37  ;;  %v2717_v37 = vsel %vm17_vm0, %v4188_v9, %v4193_v12  ;;  %v4477_v9 = vld [vmem:[%s5919_s2 + $0x1c0] sm:$0xff]   ;;  %v2719_v12 = vsel %vm17_vm0, %v4198_v47, %v4203_v58  ;;  %v4486_v47 = vld [vmem:[%s5919_s2 + $0x208] sm:$0xff]   ;;  %v4488_v58 = vld [vmem:[%s5919_s2 + $0x218] sm:$0xff]  }
 0x72a   :  { %3905 = vmatprep.subr.bf16.mxu1 %v4462_v36  ;;  %v2725_v24 = vpack.c.bf16 %v2718_v11, %v2717_v37  ;;  %v2726_v32 = vpack.c.bf16 %v2720_v63, %v2719_v12 }
 0x72d   :  { %3906 = vmatpush3.bf16.msra.mxu1 %v4462_v36 }
 0x72e   :  { %3907 = vmatprep.subr.bf16.mxu1 %v4463_v7 }
 0x731   :  { %3908 = vmatpush3.bf16.msra.mxu1 %v4463_v7 }
 0x732   :  { %3909 = vmatprep.subr.bf16.mxu1 %v4464_v54 }
 0x735   :  { %3910 = vmatpush3.bf16.msra.mxu1 %v4464_v54 }
 0x736   :  { %3911 = vmatprep.subr.bf16.mxu1 %v4465_v18 }
 0x739   :  { %3912 = vmatpush3.bf16.msra.mxu1 %v4465_v18 }
 0x73a   :  { %3913 = vmatprep.subr.bf16.mxu1 %v4466_v19 }
 0x73d   :  { %3914 = vmatpush3.bf16.msra.mxu1 %v4466_v19 }
 0x73e   :  { %3915 = vmatprep.subr.bf16.mxu1 %v4467_v55 }
 0x741   :  { %3916 = vmatpush3.bf16.msra.mxu1 %v4467_v55 }
 0x742   :  { %3917 = vmatprep.subr.bf16.mxu1 %v4468_v53 }
 0x745   :  { %3918 = vmatpush3.bf16.msra.mxu1 %v4468_v53 }
 0x746   :  { %3923 = vmatprep.subr.bf16.mxu1 %v4469_v27 }
 0x748   :  { %3920 = vmatmul.mubr.bf16.vlgmr.msra.gmra.mrb[0].mxu1 %v2566_v57  ;;  %v4475_v57 = vld [vmem:[%s5919_s2 + $0x1b0] sm:$0xff]  }
 0x749   :  { %3924 = vmatpush3.bf16.msra.mxu1 %v4469_v27  ;;  %3939 = vmatprep.mubr.bf16.mxu1 %v2725_v24 }
 0x74a   :  { %3925 = vmatprep.subr.bf16.mxu1 %v4470_v14 }
 0x74d   :  { %3926 = vmatpush3.bf16.msra.mxu1 %v4470_v14 }
 0x74e   :  { %3927 = vmatprep.subr.bf16.mxu1 %v4471_v6 }
 0x751   :  { %3928 = vmatpush3.bf16.msra.mxu1 %v4471_v6 }
 0x752   :  { %3929 = vmatprep.subr.bf16.mxu1 %v4472_v10 }
 0x755   :  { %3930 = vmatpush3.bf16.msra.mxu1 %v4472_v10 }
 0x756   :  { %3931 = vmatprep.subr.bf16.mxu1 %v4473_v41 }
 0x759   :  { %3932 = vmatpush3.bf16.msra.mxu1 %v4473_v41 }
 0x75a   :  { %3933 = vmatprep.subr.bf16.mxu1 %v4474_v17 }
 0x75d   :  { %3934 = vmatpush3.bf16.msra.mxu1 %v4474_v17 }
 0x75e   :  { %3935 = vmatprep.subr.bf16.mxu1 %v4475_v57 }
 0x761   :  { %3936 = vmatpush3.bf16.msra.mxu1 %v4475_v57 }
 0x762   :  { %3937 = vmatprep.subr.bf16.mxu1 %v4476_v8 }
 0x765   :  { %3938 = vmatpush3.bf16.msra.mxu1 %v4476_v8 }
 0x766   :  { %3943 = vmatprep.subr.bf16.mxu1 %v4477_v9 }
 0x768   :  { %3940 = vmatmul.mubr.bf16.vlgmr.msra.gmra.mrb[0].mxu1 %v2726_v32 }
 0x769   :  { %3944 = vmatpush3.bf16.msra.mxu1 %v4477_v9  ;;  %3959 = vmatprep.mubr.bf16.mxu1 %v2845_v28  ;;  %v4484_v28 = vld [vmem:[%s5919_s2 + $0x1f8] sm:$0xff]  }
 0x76a   :  { %3945 = vmatprep.subr.bf16.mxu1 %v4478_v48 }
 0x76d   :  { %3946 = vmatpush3.bf16.msra.mxu1 %v4478_v48 }
 0x76e   :  { %3947 = vmatprep.subr.bf16.mxu1 %v4479_v33 }
 0x771   :  { %3948 = vmatpush3.bf16.msra.mxu1 %v4479_v33 }
 0x772   :  { %3949 = vmatprep.subr.bf16.mxu1 %v4480_v56 }
 0x775   :  { %3950 = vmatpush3.bf16.msra.mxu1 %v4480_v56 }
 0x776   :  { %3951 = vmatprep.subr.bf16.mxu1 %v4481_v21 }
 0x779   :  { %3952 = vmatpush3.bf16.msra.mxu1 %v4481_v21 }
 0x77a   :  { %3953 = vmatprep.subr.bf16.mxu1 %v4482_v34 }
 0x77d   :  { %3954 = vmatpush3.bf16.msra.mxu1 %v4482_v34 }
 0x77e   :  { %3955 = vmatprep.subr.bf16.mxu1 %v4483_v15 }
 0x781   :  { %3956 = vmatpush3.bf16.msra.mxu1 %v4483_v15 }
 0x782   :  { %3957 = vmatprep.subr.bf16.mxu1 %v4484_v28 }
 0x785   :  { %3958 = vmatpush3.bf16.msra.mxu1 %v4484_v28 }
 0x786   :  { %3963 = vmatprep.subr.bf16.mxu1 %v4485_v43 }
 0x788   :  { %3960 = vmatmul.mubr.bf16.vlgmr.msra.gmra.mrb[0].mxu1 %v2846_v3  ;;  %v4491_v3 = vld [vmem:[%s5919_s2 + $0x230] sm:$0xff]  }
 0x789   :  { %3964 = vmatpush3.bf16.msra.mxu1 %v4485_v43  ;;  %3979 = vmatprep.mubr.bf16.mxu1 %v2965_v49 }
 0x78a   :  { %3965 = vmatprep.subr.bf16.mxu1 %v4486_v47 }
 0x78d   :  { %3966 = vmatpush3.bf16.msra.mxu1 %v4486_v47 }
 0x78e   :  { %3967 = vmatprep.subr.bf16.mxu1 %v4487_v46 }
 0x791   :  { %3968 = vmatpush3.bf16.msra.mxu1 %v4487_v46 }
 0x792   :  { %3969 = vmatprep.subr.bf16.mxu1 %v4488_v58 }
 0x795   :  { %3970 = vmatpush3.bf16.msra.mxu1 %v4488_v58 }
 0x796   :  { %3971 = vmatprep.subr.bf16.mxu1 %v4489_v29 }
 0x799   :  { %3972 = vmatpush3.bf16.msra.mxu1 %v4489_v29 }
 0x79a   :  { %3973 = vmatprep.subr.bf16.mxu1 %v4490_v30 }
 0x79d   :  { %3974 = vmatpush3.bf16.msra.mxu1 %v4490_v30 }
 0x79e   :  { %3975 = vmatprep.subr.bf16.mxu1 %v4491_v3 }
 0x7a1   :  { %3976 = vmatpush3.bf16.msra.mxu1 %v4491_v3 }
 0x7a2   :  { %3977 = vmatprep.subr.bf16.mxu1 %v4492_v5 }
 0x7a5   :  { %3978 = vmatpush3.bf16.msra.mxu1 %v4492_v5 }
 0x7a8   :  { %3980 = vmatmul.mubr.bf16.vlgmr.msra.gmra.mrb[0].mxu1 %v5921_v13 }
 0x87b   :  { %v3981_v49 = vpop.f32.mrb[0].mxu1 }
 0x87c   :  { %v3066_v44 = vpop.f32.mrb[1].mxu1 }
 0x87d   :  { %v3982_v45 = vpop.f32.mrb[2].mxu1 }
 0x87e   :  { %v3092_v25 = vadd.f32 %v3982_v45, %v3981_v49  ;;  %v3069_v50 = vpop.f32.mrb[3].mxu1 }
 0x87f   :  { %v3085_v39 = vadd.f32 %v3069_v50, %v3066_v44 }
 0x880   :  { %v3093_v40 = vrot.slane %v3092_v25, 4 }
 0x881   :  { %v3086_v51 = vrot.slane %v3085_v39, 4 }
 0x882   :  { %v3094_v52 = vadd.f32 %v3093_v40, %v3092_v25 }
 0x883   :  { %v3087_v23 = vadd.f32 %v3086_v51, %v3085_v39 }
 0x884   :  { %v3095_v16 = vrot.slane %v3094_v52, 2 }
 0x885   :  { %v3088_v26 = vrot.slane %v3087_v23, 2 }
 0x886   :  { %v3096_v35 = vadd.f32 %v3095_v16, %v3094_v52 }
 0x887   :  { %v3089_v38 = vadd.f32 %v3088_v26, %v3087_v23 }
 0x888   :  { %v3097_v60 = vrot.slane %v3096_v35, 1 }
 0x889   :  { %v3090_v31 = vrot.slane %v3089_v38, 1 }
 0x88a   :  { %v3098_v42 = vadd.f32 %v3097_v60, %v3096_v35 }
 0x88b   :  { %v3091_v20 = vadd.f32 %v3090_v31, %v3089_v38 }
 0x88c   :  { %3103 = vrot.lane.b32.xlu1 %v3098_v42, %s4522_s6 }
 0x88d   :  { %3101 = vrot.lane.b32.xlu0 %v3091_v20, %s4522_s6 }
 0x8fe   :  { %v3104_v59 = vpop.permute.xlu1 %3103 }
 0x8ff   :  { %v3108_v22 = vadd.f32 %v3104_v59, %v3098_v42  ;;  %v3102_v61 = vpop.permute.xlu0 %3101 }
 0x900   :  { %v3107_v36 = vadd.f32 %v3102_v61, %v3091_v20 }
 0x901   :  { %3113 = vrot.lane.b32.xlu1 %v3108_v22, %s4524_s1 }
 0x902   :  { %3111 = vrot.lane.b32.xlu0 %v3107_v36, %s4524_s1 }
 0x973   :  { %v3114_v7 = vpop.permute.xlu1 %3113 }
 0x974   :  { %v3118_v54 = vadd.f32 %v3114_v7, %v3108_v22  ;;  %v3112_v18 = vpop.permute.xlu0 %3111 }
 0x975   :  { %v3117_v19 = vadd.f32 %v3112_v18, %v3107_v36 }
 0x976   :  { %3123 = vrot.lane.b32.xlu1 %v3118_v54, %s4525_s22 }
 0x977   :  { %3121 = vrot.lane.b32.xlu0 %v3117_v19, %s4525_s22 }
 0x9e8   :  { %v3124_v55 = vpop.permute.xlu1 %3123 }
 0x9e9   :  { %v3128_v53 = vadd.f32 %v3124_v55, %v3118_v54  ;;  %v3122_v27 = vpop.permute.xlu0 %3121 }
 0x9ea   :  { %v3127_v37 = vadd.f32 %v3122_v27, %v3117_v19 }
 0x9eb   :  { %3133 = vrot.lane.b32.xlu1 %v3128_v53, %s4526_s23 }
 0x9ec   :  { %3131 = vrot.lane.b32.xlu0 %v3127_v37, %s4526_s23 }
 0xa5d   :  { %v3134_v11 = vpop.permute.xlu1 %3133 }
 0xa5e   :  { %v3138_v14 = vadd.f32 %v3134_v11, %v3128_v53  ;;  %v3132_v24 = vpop.permute.xlu0 %3131 }
 0xa5f   :  { %v3137_v6 = vadd.f32 %v3132_v24, %v3127_v37 }
 0xa60   :  { %v3140_v10 = vmul.f32 0.00390625, %v3138_v14 }
 0xa61   :  { %v3139_v41 = vmul.f32 0.00390625, %v3137_v6 }
 0xa62   :  { %v3148_v17 = vrot.slane %v3140_v10, %v5335_v62 }
 0xa63   :  { %v3144_v57 = vrot.slane %v3139_v41, %v5335_v62 }
 0xa64   :  { %v3151_v8 = vsub.f32 %v3981_v49, %v3148_v17  ;;  %v3152_v9 = vsub.f32 %v3982_v45, %v3148_v17 }
 0xa65   :  { %v3149_v63 = vsub.f32 %v3066_v44, %v3144_v57  ;;  %v3150_v12 = vsub.f32 %v3069_v50, %v3144_v57 }
 0xa66   :  { %v3155_v32 = vmul.f32 %v3151_v8, %v3151_v8  ;;  %v3156_v48 = vmul.f32 %v3152_v9, %v3152_v9 }
 0xa67   :  { %v3153_v33 = vmul.f32 %v3149_v63, %v3149_v63  ;;  %v3154_v56 = vmul.f32 %v3150_v12, %v3150_v12 }
 0xa68   :  { %v3164_v21 = vadd.f32 %v3156_v48, %v3155_v32 }
 0xa69   :  { %v3157_v34 = vadd.f32 %v3154_v56, %v3153_v33 }
 0xa6a   :  { %v3165_v15 = vrot.slane %v3164_v21, 4 }
 0xa6b   :  { %v3158_v28 = vrot.slane %v3157_v34, 4 }
 0xa6c   :  { %v3166_v43 = vadd.f32 %v3165_v15, %v3164_v21 }
 0xa6d   :  { %v3159_v47 = vadd.f32 %v3158_v28, %v3157_v34 }
 0xa6e   :  { %v3167_v46 = vrot.slane %v3166_v43, 2 }
 0xa6f   :  { %v3160_v58 = vrot.slane %v3159_v47, 2 }
 0xa70   :  { %v3168_v29 = vadd.f32 %v3167_v46, %v3166_v43 }
 0xa71   :  { %v3161_v30 = vadd.f32 %v3160_v58, %v3159_v47 }
 0xa72   :  { %v3169_v3 = vrot.slane %v3168_v29, 1 }
 0xa73   :  { %v3162_v5 = vrot.slane %v3161_v30, 1 }
 0xa74   :  { %v3170_v13 = vadd.f32 %v3169_v3, %v3168_v29 }
 0xa75   :  { %v3163_v49 = vadd.f32 %v3162_v5, %v3161_v30 }
 0xa76   :  { %3175 = vrot.lane.b32.xlu1 %v3170_v13, %s4522_s6 }
 0xa77   :  { %3173 = vrot.lane.b32.xlu0 %v3163_v49, %s4522_s6 }
 0xae8   :  { %v3176_v44 = vpop.permute.xlu1 %3175 }
 0xae9   :  { %v3180_v45 = vadd.f32 %v3176_v44, %v3170_v13  ;;  %v3174_v25 = vpop.permute.xlu0 %3173 }
 0xaea   :  { %v3179_v50 = vadd.f32 %v3174_v25, %v3163_v49 }
 0xaeb   :  { %3185 = vrot.lane.b32.xlu1 %v3180_v45, %s4524_s1 }
 0xaec   :  { %3183 = vrot.lane.b32.xlu0 %v3179_v50, %s4524_s1 }
 0xb5d   :  { %v3186_v39 = vpop.permute.xlu1 %3185 }
 0xb5e   :  { %v3190_v40 = vadd.f32 %v3186_v39, %v3180_v45  ;;  %v3184_v51 = vpop.permute.xlu0 %3183 }
 0xb5f   :  { %v3189_v52 = vadd.f32 %v3184_v51, %v3179_v50 }
 0xb60   :  { %3195 = vrot.lane.b32.xlu1 %v3190_v40, %s4525_s22 }
 0xb61   :  { %3193 = vrot.lane.b32.xlu0 %v3189_v52, %s4525_s22 }
 0xbd2   :  { %v3196_v23 = vpop.permute.xlu1 %3195 }
 0xbd3   :  { %v3200_v16 = vadd.f32 %v3196_v23, %v3190_v40  ;;  %v3194_v26 = vpop.permute.xlu0 %3193 }
 0xbd4   :  { %v3199_v35 = vadd.f32 %v3194_v26, %v3189_v52 }
 0xbd5   :  { %3205 = vrot.lane.b32.xlu1 %v3200_v16, %s4526_s23 }
 0xbd6   :  { %3203 = vrot.lane.b32.xlu0 %v3199_v35, %s4526_s23 }
 0xc47   :  { %v3206_v38 = vpop.permute.xlu1 %3205 }
 0xc48   :  { %v3210_v60 = vadd.f32 %v3206_v38, %v3200_v16  ;;  %v3204_v31 = vpop.permute.xlu0 %3203 }
 0xc49   :  { %v3209_v42 = vadd.f32 %v3204_v31, %v3199_v35 }
 0xc4a   :  { %v3212_v20 = vmul.f32 0.00390625, %v3210_v60 }
 0xc4b   :  { %v3211_v59 = vmul.f32 0.00390625, %v3209_v42 }
 0xc4c   :  { %v3214_v22 = vadd.f32 1e-05, %v3212_v20 }
 0xc4d   :  { %v3213_v61 = vadd.f32 1e-05, %v3211_v59 }
 0xc4e   :  { %4517 = vrsqrt.f32 %v3214_v22 }
 0xc4f   :  { %4519 = vrsqrt.f32 %v3213_v61 }
 0xc58   :  { %v4518_v36 = vpop.eup %4517 }
 0xc59   :  { %v4520_v7 = vpop.eup %4519  ;;  %v3224_v54 = vrot.slane %v4518_v36, %v5335_v62 }
 0xc5a   :  { %v3220_v18 = vrot.slane %v4520_v7, %v5335_v62 }
 0xc5b   :  { %v3227_v19 = vmul.f32 %v3224_v54, %v3151_v8  ;;  %v3228_v55 = vmul.f32 %v3224_v54, %v3152_v9 }
 0xc5c   :  { %v3225_v53 = vmul.f32 %v3220_v18, %v3149_v63  ;;  %v3226_v27 = vmul.f32 %v3220_v18, %v3150_v12 }
 0xc5d   :  { %v3231_v37 = vadd.f32 %v3227_v19, %v4560_v2  ;;  %v3232_v11 = vadd.f32 %v3228_v55, %v4570_v4 }
 0xc5e   :  { %v3229_v14 = vadd.f32 %v3225_v53, %v4550_v0  ;;  %v3230_v24 = vadd.f32 %v3226_v27, %v4555_v1 }
 0xc5f   :  { %3235 = vst [vmem:[%s5920_s3 + $0x10] sm:$0xff] %v3231_v37  ;;  %3236 = vst [vmem:[%s5920_s3 + $0x18] sm:$0xff] %v3232_v11 }
 0xc60   :  { %3233 = vst [vmem:[%s5920_s3] sm:$0xff] %v3229_v14  ;;  %3234 = vst [vmem:[%s5920_s3 + $0x8] sm:$0xff] %v3230_v24 }

</bundles_post_ra>
